<compile_context>
chip_gen: v7x
topology: tpu7x:2x2x1
jax: 0.10.0
libtpu: 0.0.40
codegen_flags: <defaults>
</compile_context>

<pallas_src>
import functools

import jax
import jax.numpy as jnp
from jax.experimental import pallas as pl
from jax.experimental.pallas import tpu as pltpu


def _vae_kernel(x_ref, eps_ref,
                w1, b1, w2, b2, w3z, b3z,
                w4, b4, w5, b5, w6, b6,
                recon_ref, muvar_ref, *, z_dim):
    f32 = jnp.float32
    bf16 = jnp.bfloat16

    x = x_ref[...]                      # already bf16 (MXU-native input)

    # ----- encode (bf16 MXU inputs, fp32 accumulation) -----
    h1 = jnp.maximum(
        jnp.dot(x, w1[...], preferred_element_type=f32) + b1[...], 0.0)
    h2 = jnp.maximum(
        jnp.dot(h1.astype(bf16), w2[...], preferred_element_type=f32) + b2[...], 0.0)
    # Fused mu/logvar head: single (hl2, 2*z_dim) matmul, split in registers.
    muvar = jnp.dot(h2.astype(bf16), w3z[...], preferred_element_type=f32) + b3z[...]
    mu = muvar[:, :z_dim]
    logvar = muvar[:, z_dim:]

    # ----- reparameterize (fp32) -----
    std = jnp.exp(0.5 * logvar)
    z = mu + eps_ref[...] * std

    # ----- decode -----
    h3 = jnp.maximum(
        jnp.dot(z.astype(bf16), w4[...], preferred_element_type=f32) + b4[...], 0.0)
    h4 = jnp.maximum(
        jnp.dot(h3.astype(bf16), w5[...], preferred_element_type=f32) + b5[...], 0.0)
    logits = jnp.dot(h4.astype(bf16), w6[...], preferred_element_type=f32) + b6[...]
    recon = jax.nn.sigmoid(logits)

    recon_ref[...] = recon.astype(recon_ref.dtype)   # bf16 (lane-dense, in [0,1])
    muvar_ref[...] = muvar                           # fp32 packed mu|logvar


def init_vae_params(key, img_res=16, z_dim=16):
    """PyTorch-style init: U(-1/sqrt(fan_in), 1/sqrt(fan_in)).

    Weights are stored already transposed to (in, out); biases as (1, out).
    """
    img_dim = img_res * img_res
    hl1 = img_dim // 2
    hl2 = hl1 // 2
    dims = [
        ("fc1", img_dim, hl1),
        ("fc2", hl1, hl2),
        ("fc31", hl2, z_dim),
        ("fc32", hl2, z_dim),
        ("fc4", z_dim, hl2),
        ("fc5", hl2, hl1),
        ("fc6", hl1, img_dim),
    ]
    params = {}
    keys = jax.random.split(key, 2 * len(dims))
    for i, (name, fan_in, fan_out) in enumerate(dims):
        bound = 1.0 / (fan_in ** 0.5)
        w = jax.random.uniform(keys[2 * i], (fan_in, fan_out),
                               minval=-bound, maxval=bound, dtype=jnp.float32)
        b = jax.random.uniform(keys[2 * i + 1], (1, fan_out),
                               minval=-bound, maxval=bound, dtype=jnp.float32)
        params[name] = (w, b)
    return params


def prepack_vae_params(params):
    """One-time packing (call OUTSIDE the hot path): bf16 weights, fp32 biases,
    fc31/fc32 fused into a single (hl2, 2*z_dim) head."""
    def wb(name):
        w, b = params[name]
        return w.astype(jnp.bfloat16), b.astype(jnp.float32)

    w1, b1 = wb("fc1")
    w2, b2 = wb("fc2")
    w31, b31 = wb("fc31")
    w32, b32 = wb("fc32")
    w4, b4 = wb("fc4")
    w5, b5 = wb("fc5")
    w6, b6 = wb("fc6")
    w3z = jnp.concatenate([w31, w32], axis=1)
    b3z = jnp.concatenate([b31, b32], axis=1)
    return (w1, b1, w2, b2, w3z, b3z, w4, b4, w5, b5, w6, b6)


def _round_up(a, b):
    return (a + b - 1) // b * b


def _per_row_vmem_bytes(img_dim, hl1, hl2, z_dim):
    """Rough per-batch-row VMEM upper bound for tile sizing."""
    # double-buffered tiled I/O: x (bf16), eps (fp32), recon (bf16), muvar (fp32)
    io = 2 * (img_dim * 2 + z_dim * 4 + img_dim * 2 + 2 * z_dim * 4)
    # fp32 intermediates (h1, h2, muvar, z, h3, h4, logits, recon)
    inter = 4 * (hl1 + hl2 + 2 * z_dim + z_dim + hl2 + hl1 + 2 * img_dim)
    return io + inter


@functools.partial(jax.jit, static_argnames=("img_res", "z_dim", "batch_tile"))
def vae_forward(x, eps, packed_params, img_res=16, z_dim=16, batch_tile=4096):
    B, img_dim = x.shape
    assert img_dim == img_res * img_res
    assert eps.shape == (B, z_dim)
    hl1 = img_dim // 2
    hl2 = hl1 // 2

    flat_params = list(packed_params)

    # bf16 kernel I/O for the wide tensors; fp32 eps (tiny, precision-relevant).
    x = x.astype(jnp.bfloat16)
    eps = eps.astype(jnp.float32)

    # --- batch tile sizing (all static Python math at trace time) ---
    batch_tile = max(16, (int(batch_tile) // 16) * 16)        # clamp to 16-multiple
    per_row = _per_row_vmem_bytes(img_dim, hl1, hl2, z_dim)
    weight_vmem = 2 * sum(int(p.size) * p.dtype.itemsize for p in flat_params)
    vmem_budget = max((28 << 20) - weight_vmem, 1 << 20)
    tb_cap = max(16, (int(vmem_budget // per_row) // 16) * 16)
    # At most two tiles: one per TensorCore on v7x, 1-2 serial steps elsewhere.
    two_tile = _round_up(max((B + 1) // 2, 16), 16)
    tb = max(16, min(batch_tile, tb_cap, two_tile))

    B_pad = _round_up(B, tb)
    if B_pad != B:
        x = jnp.pad(x, ((0, B_pad - B), (0, 0)))
        eps = jnp.pad(eps, ((0, B_pad - B), (0, 0)))
    grid = (B_pad // tb,)

    # x / eps / outputs tiled over batch; weights fully resident (constant map).
    x_spec = pl.BlockSpec((tb, img_dim), lambda i: (i, 0))
    eps_spec = pl.BlockSpec((tb, z_dim), lambda i: (i, 0))
    param_specs = [pl.BlockSpec(p.shape, lambda i: (0, 0)) for p in flat_params]
    recon_spec = pl.BlockSpec((tb, img_dim), lambda i: (i, 0))
    muvar_spec = pl.BlockSpec((tb, 2 * z_dim), lambda i: (i, 0))

    out_shapes = (
        jax.ShapeDtypeStruct((B_pad, img_dim), jnp.bfloat16),    # reconstruction
        jax.ShapeDtypeStruct((B_pad, 2 * z_dim), jnp.float32),   # mu | logvar packed
    )

    flops = 2 * B_pad * (img_dim * hl1 + hl1 * hl2 + hl2 * 2 * z_dim
                         + z_dim * hl2 + hl2 * hl1 + hl1 * img_dim)
    transcendentals = B_pad * (z_dim + img_dim)          # exp(0.5*logvar) + sigmoid
    weight_bytes = sum(int(p.size) * p.dtype.itemsize for p in flat_params)
    bytes_accessed = (x.size * 2 + eps.size * 4 + weight_bytes
                      + B_pad * img_dim * 2 + B_pad * 2 * z_dim * 4)

    recon, muvar = pl.pallas_call(
        functools.partial(_vae_kernel, z_dim=z_dim),
        out_shape=out_shapes,
        grid=grid,
        in_specs=[x_spec, eps_spec] + param_specs,
        out_specs=(recon_spec, muvar_spec),
        compiler_params=pltpu.CompilerParams(
            dimension_semantics=("parallel",),
            vmem_limit_bytes=32 << 20),
        cost_estimate=pl.CostEstimate(
            flops=flops, transcendentals=transcendentals,
            bytes_accessed=int(bytes_accessed)),
    )(x, eps, *flat_params)

    recon = recon[:B].astype(jnp.float32)   # cast back for fp32 downstream API
    mu = muvar[:B, :z_dim]
    logvar = muvar[:B, z_dim:]
    return recon, mu, logvar


if __name__ == "__main__":
    img_res = 16          # small config: img_dim=256, hl1=128, hl2=64
    z_dim = 16
    batch = 200           # non-multiple of 16: exercises pad + 2-tile grid

    key = jax.random.PRNGKey(0)
    k_params, k_x, k_eps = jax.random.split(key, 3)

    params = init_vae_params(k_params, img_res=img_res, z_dim=z_dim)
    packed = prepack_vae_params(params)   # one-time packing, outside the hot path

    x = jax.random.uniform(k_x, (batch, img_res * img_res), dtype=jnp.float32)
    eps = jax.random.normal(k_eps, (batch, z_dim), dtype=jnp.float32)

    # Callers pass bf16 x so the kernel streams bf16 from HBM.
    recon, mu, logvar = vae_forward(x.astype(jnp.bfloat16), eps, packed,
                                    img_res=img_res, z_dim=z_dim)
    jax.block_until_ready((recon, mu, logvar))

    # Pure-JAX fp32 reference (kernel feeds the MXU bf16 -> loosened tolerance).
    def ref_forward(x, eps, params):
        def lin(h, name):
            w, b = params[name]
            return h @ w + b
        h1 = jax.nn.relu(lin(x, "fc1"))
        h2 = jax.nn.relu(lin(h1, "fc2"))
        mu_r = lin(h2, "fc31")
        logvar_r = lin(h2, "fc32")
        z = mu_r + eps * jnp.exp(0.5 * logvar_r)
        h3 = jax.nn.relu(lin(z, "fc4"))
        h4 = jax.nn.relu(lin(h3, "fc5"))
        return jax.nn.sigmoid(lin(h4, "fc6")), mu_r, logvar_r

    r_ref, mu_r, lv_r = ref_forward(x, eps, params)
    assert jnp.allclose(recon, r_ref, atol=5e-2, rtol=5e-2), "recon mismatch"
    assert jnp.allclose(mu, mu_r, atol=5e-2, rtol=5e-2), "mu mismatch"
    assert jnp.allclose(logvar, lv_r, atol=5e-2, rtol=5e-2), "logvar mismatch"

    print("KERNEL_OK")
</pallas_src>

<mosaic_0001>
module attributes {stable_mosaic.version = 11 : i64} {
  func.func @_vae_kernel(%arg0: i32, %arg1: memref<112x256xbf16, #tpu.memory_space<vmem>>, %arg2: memref<112x16xf32, #tpu.memory_space<vmem>>, %arg3: memref<256x128xbf16, #tpu.memory_space<vmem>>, %arg4: memref<1x128xf32, #tpu.memory_space<vmem>>, %arg5: memref<128x64xbf16, #tpu.memory_space<vmem>>, %arg6: memref<1x64xf32, #tpu.memory_space<vmem>>, %arg7: memref<64x32xbf16, #tpu.memory_space<vmem>>, %arg8: memref<1x32xf32, #tpu.memory_space<vmem>>, %arg9: memref<16x64xbf16, #tpu.memory_space<vmem>>, %arg10: memref<1x64xf32, #tpu.memory_space<vmem>>, %arg11: memref<64x128xbf16, #tpu.memory_space<vmem>>, %arg12: memref<1x128xf32, #tpu.memory_space<vmem>>, %arg13: memref<128x256xbf16, #tpu.memory_space<vmem>>, %arg14: memref<1x256xf32, #tpu.memory_space<vmem>>, %arg15: memref<112x256xbf16, #tpu.memory_space<vmem>>, %arg16: memref<112x32xf32, #tpu.memory_space<vmem>>) attributes {dimension_semantics = [#tpu.dimension_semantics<parallel>], iteration_bounds = array<i64: 2>, scalar_prefetch = 0 : i64, scratch_operands = 0 : i64, tpu.core_type = #tpu.core_type<tc>, window_params = [{transform_indices = @transform_0, window_bounds = array<i64: 112, 256>}, {transform_indices = @transform_1, window_bounds = array<i64: 112, 16>}, {pipeline_mode = #tpu.pipeline_mode<synchronous>, transform_indices = @transform_2, window_bounds = array<i64: 256, 128>}, {pipeline_mode = #tpu.pipeline_mode<synchronous>, transform_indices = @transform_3, window_bounds = array<i64: 1, 128>}, {pipeline_mode = #tpu.pipeline_mode<synchronous>, transform_indices = @transform_4, window_bounds = array<i64: 128, 64>}, {pipeline_mode = #tpu.pipeline_mode<synchronous>, transform_indices = @transform_5, window_bounds = array<i64: 1, 64>}, {pipeline_mode = #tpu.pipeline_mode<synchronous>, transform_indices = @transform_6, window_bounds = array<i64: 64, 32>}, {pipeline_mode = #tpu.pipeline_mode<synchronous>, transform_indices = @transform_7, window_bounds = array<i64: 1, 32>}, {pipeline_mode = #tpu.pipeline_mode<synchronous>, transform_indices = @transform_8, window_bounds = array<i64: 16, 64>}, {pipeline_mode = #tpu.pipeline_mode<synchronous>, transform_indices = @transform_9, window_bounds = array<i64: 1, 64>}, {pipeline_mode = #tpu.pipeline_mode<synchronous>, transform_indices = @transform_10, window_bounds = array<i64: 64, 128>}, {pipeline_mode = #tpu.pipeline_mode<synchronous>, transform_indices = @transform_11, window_bounds = array<i64: 1, 128>}, {pipeline_mode = #tpu.pipeline_mode<synchronous>, transform_indices = @transform_12, window_bounds = array<i64: 128, 256>}, {pipeline_mode = #tpu.pipeline_mode<synchronous>, transform_indices = @transform_13, window_bounds = array<i64: 1, 256>}, {transform_indices = @transform_14, window_bounds = array<i64: 112, 256>}, {transform_indices = @transform_15, window_bounds = array<i64: 112, 32>}]} {
    %c0 = arith.constant 0 : index
    %c0_0 = arith.constant 0 : index
    %0 = vector.load %arg1[%c0, %c0_0] : memref<112x256xbf16, #tpu.memory_space<vmem>>, vector<112x256xbf16>
    %c0_1 = arith.constant 0 : index
    %c0_2 = arith.constant 0 : index
    %1 = vector.load %arg3[%c0_1, %c0_2] : memref<256x128xbf16, #tpu.memory_space<vmem>>, vector<256x128xbf16>
    %cst = arith.constant dense<0.000000e+00> : vector<112x128xf32>
    %2 = tpu.matmul %0, %1, %cst {dimension_numbers = #tpu.dot_dimension_numbers<[1], [0], [0], [1], [0, 0, 1, 1], [], []>} : vector<112x256xbf16>, vector<256x128xbf16>, vector<112x128xf32> -> vector<112x128xf32>
    %c0_3 = arith.constant 0 : index
    %c0_4 = arith.constant 0 : index
    %3 = vector.load %arg4[%c0_3, %c0_4] : memref<1x128xf32, #tpu.memory_space<vmem>>, vector<1x128xf32>
    %4 = vector.broadcast %3 : vector<1x128xf32> to vector<112x128xf32>
    %5 = arith.addf %2, %4 : vector<112x128xf32>
    %cst_5 = arith.constant 0.000000e+00 : f32
    %6 = vector.broadcast %cst_5 : f32 to vector<112x128xf32>
    %7 = arith.maximumf %5, %6 : vector<112x128xf32>
    %8 = arith.truncf %7 : vector<112x128xf32> to vector<112x128xbf16>
    %c0_6 = arith.constant 0 : index
    %c0_7 = arith.constant 0 : index
    %9 = vector.load %arg5[%c0_6, %c0_7] : memref<128x64xbf16, #tpu.memory_space<vmem>>, vector<128x64xbf16>
    %cst_8 = arith.constant dense<0.000000e+00> : vector<112x64xf32>
    %10 = tpu.matmul %8, %9, %cst_8 {dimension_numbers = #tpu.dot_dimension_numbers<[1], [0], [0], [1], [0, 0, 1, 1], [], []>} : vector<112x128xbf16>, vector<128x64xbf16>, vector<112x64xf32> -> vector<112x64xf32>
    %c0_9 = arith.constant 0 : index
    %c0_10 = arith.constant 0 : index
    %11 = vector.load %arg6[%c0_9, %c0_10] : memref<1x64xf32, #tpu.memory_space<vmem>>, vector<1x64xf32>
    %12 = vector.broadcast %11 : vector<1x64xf32> to vector<112x64xf32>
    %13 = arith.addf %10, %12 : vector<112x64xf32>
    %cst_11 = arith.constant 0.000000e+00 : f32
    %14 = vector.broadcast %cst_11 : f32 to vector<112x64xf32>
    %15 = arith.maximumf %13, %14 : vector<112x64xf32>
    %16 = arith.truncf %15 : vector<112x64xf32> to vector<112x64xbf16>
    %c0_12 = arith.constant 0 : index
    %c0_13 = arith.constant 0 : index
    %17 = vector.load %arg7[%c0_12, %c0_13] : memref<64x32xbf16, #tpu.memory_space<vmem>>, vector<64x32xbf16>
    %cst_14 = arith.constant dense<0.000000e+00> : vector<112x32xf32>
    %18 = tpu.matmul %16, %17, %cst_14 {dimension_numbers = #tpu.dot_dimension_numbers<[1], [0], [0], [1], [0, 0, 1, 1], [], []>} : vector<112x64xbf16>, vector<64x32xbf16>, vector<112x32xf32> -> vector<112x32xf32>
    %c0_15 = arith.constant 0 : index
    %c0_16 = arith.constant 0 : index
    %19 = vector.load %arg8[%c0_15, %c0_16] : memref<1x32xf32, #tpu.memory_space<vmem>>, vector<1x32xf32>
    %20 = vector.broadcast %19 : vector<1x32xf32> to vector<112x32xf32>
    %21 = arith.addf %18, %20 : vector<112x32xf32>
    %22 = vector.extract_strided_slice %21 {offsets = [0, 0], sizes = [112, 16], strides = [1, 1]} : vector<112x32xf32> to vector<112x16xf32>
    %23 = vector.extract_strided_slice %21 {offsets = [0, 16], sizes = [112, 16], strides = [1, 1]} : vector<112x32xf32> to vector<112x16xf32>
    %cst_17 = arith.constant 5.000000e-01 : f32
    %24 = vector.broadcast %cst_17 : f32 to vector<112x16xf32>
    %25 = arith.mulf %24, %23 : vector<112x16xf32>
    %26 = math.exp %25 : vector<112x16xf32>
    %c0_18 = arith.constant 0 : index
    %c0_19 = arith.constant 0 : index
    %27 = vector.load %arg2[%c0_18, %c0_19] : memref<112x16xf32, #tpu.memory_space<vmem>>, vector<112x16xf32>
    %28 = arith.mulf %27, %26 : vector<112x16xf32>
    %29 = arith.addf %22, %28 : vector<112x16xf32>
    %30 = arith.truncf %29 : vector<112x16xf32> to vector<112x16xbf16>
    %c0_20 = arith.constant 0 : index
    %c0_21 = arith.constant 0 : index
    %31 = vector.load %arg9[%c0_20, %c0_21] : memref<16x64xbf16, #tpu.memory_space<vmem>>, vector<16x64xbf16>
    %cst_22 = arith.constant dense<0.000000e+00> : vector<112x64xf32>
    %32 = tpu.matmul %30, %31, %cst_22 {dimension_numbers = #tpu.dot_dimension_numbers<[1], [0], [0], [1], [0, 0, 1, 1], [], []>} : vector<112x16xbf16>, vector<16x64xbf16>, vector<112x64xf32> -> vector<112x64xf32>
    %c0_23 = arith.constant 0 : index
    %c0_24 = arith.constant 0 : index
    %33 = vector.load %arg10[%c0_23, %c0_24] : memref<1x64xf32, #tpu.memory_space<vmem>>, vector<1x64xf32>
    %34 = vector.broadcast %33 : vector<1x64xf32> to vector<112x64xf32>
    %35 = arith.addf %32, %34 : vector<112x64xf32>
    %cst_25 = arith.constant 0.000000e+00 : f32
    %36 = vector.broadcast %cst_25 : f32 to vector<112x64xf32>
    %37 = arith.maximumf %35, %36 : vector<112x64xf32>
    %38 = arith.truncf %37 : vector<112x64xf32> to vector<112x64xbf16>
    %c0_26 = arith.constant 0 : index
    %c0_27 = arith.constant 0 : index
    %39 = vector.load %arg11[%c0_26, %c0_27] : memref<64x128xbf16, #tpu.memory_space<vmem>>, vector<64x128xbf16>
    %cst_28 = arith.constant dense<0.000000e+00> : vector<112x128xf32>
    %40 = tpu.matmul %38, %39, %cst_28 {dimension_numbers = #tpu.dot_dimension_numbers<[1], [0], [0], [1], [0, 0, 1, 1], [], []>} : vector<112x64xbf16>, vector<64x128xbf16>, vector<112x128xf32> -> vector<112x128xf32>
    %c0_29 = arith.constant 0 : index
    %c0_30 = arith.constant 0 : index
    %41 = vector.load %arg12[%c0_29, %c0_30] : memref<1x128xf32, #tpu.memory_space<vmem>>, vector<1x128xf32>
    %42 = vector.broadcast %41 : vector<1x128xf32> to vector<112x128xf32>
    %43 = arith.addf %40, %42 : vector<112x128xf32>
    %cst_31 = arith.constant 0.000000e+00 : f32
    %44 = vector.broadcast %cst_31 : f32 to vector<112x128xf32>
    %45 = arith.maximumf %43, %44 : vector<112x128xf32>
    %46 = arith.truncf %45 : vector<112x128xf32> to vector<112x128xbf16>
    %c0_32 = arith.constant 0 : index
    %c0_33 = arith.constant 0 : index
    %47 = vector.load %arg13[%c0_32, %c0_33] : memref<128x256xbf16, #tpu.memory_space<vmem>>, vector<128x256xbf16>
    %cst_34 = arith.constant dense<0.000000e+00> : vector<112x256xf32>
    %48 = tpu.matmul %46, %47, %cst_34 {dimension_numbers = #tpu.dot_dimension_numbers<[1], [0], [0], [1], [0, 0, 1, 1], [], []>} : vector<112x128xbf16>, vector<128x256xbf16>, vector<112x256xf32> -> vector<112x256xf32>
    %c0_35 = arith.constant 0 : index
    %c0_36 = arith.constant 0 : index
    %49 = vector.load %arg14[%c0_35, %c0_36] : memref<1x256xf32, #tpu.memory_space<vmem>>, vector<1x256xf32>
    %50 = vector.broadcast %49 : vector<1x256xf32> to vector<112x256xf32>
    %51 = arith.addf %48, %50 : vector<112x256xf32>
    %52 = arith.negf %51 : vector<112x256xf32>
    %53 = math.exp %52 : vector<112x256xf32>
    %cst_37 = arith.constant 1.000000e+00 : f32
    %54 = vector.broadcast %cst_37 : f32 to vector<112x256xf32>
    %55 = arith.addf %54, %53 : vector<112x256xf32>
    %56 = arith.divf %54, %55 : vector<112x256xf32>
    %57 = arith.truncf %56 : vector<112x256xf32> to vector<112x256xbf16>
    %c0_38 = arith.constant 0 : index
    %c0_39 = arith.constant 0 : index
    %58 = vector.load %arg15[%c0_38, %c0_39] : memref<112x256xbf16, #tpu.memory_space<vmem>>, vector<112x256xbf16>
    tpu.vector_store %arg15[%c0_38, %c0_39], %57 {strides = array<i32>} : memref<112x256xbf16, #tpu.memory_space<vmem>>, vector<112x256xbf16>,
    %c0_40 = arith.constant 0 : index
    %c0_41 = arith.constant 0 : index
    %59 = vector.load %arg16[%c0_40, %c0_41] : memref<112x32xf32, #tpu.memory_space<vmem>>, vector<112x32xf32>
    tpu.vector_store %arg16[%c0_40, %c0_41], %21 {strides = array<i32>} : memref<112x32xf32, #tpu.memory_space<vmem>>, vector<112x32xf32>,
    return
  }
  func.func @transform_0(%arg0: i32) -> (i32, i32) {
    %c0_i32 = arith.constant 0 : i32
    %c0_i32_0 = arith.constant 0 : i32
    return %arg0, %c0_i32 : i32, i32
  }
  func.func @transform_1(%arg0: i32) -> (i32, i32) {
    %c0_i32 = arith.constant 0 : i32
    %c0_i32_0 = arith.constant 0 : i32
    return %arg0, %c0_i32 : i32, i32
  }
  func.func @transform_2(%arg0: i32) -> (i32, i32) {
    %c0_i32 = arith.constant 0 : i32
    %c0_i32_0 = arith.constant 0 : i32
    %c0_i32_1 = arith.constant 0 : i32
    return %c0_i32, %c0_i32_0 : i32, i32
  }
  func.func @transform_3(%arg0: i32) -> (i32, i32) {
    %c0_i32 = arith.constant 0 : i32
    %c0_i32_0 = arith.constant 0 : i32
    %c0_i32_1 = arith.constant 0 : i32
    return %c0_i32, %c0_i32_0 : i32, i32
  }
  func.func @transform_4(%arg0: i32) -> (i32, i32) {
    %c0_i32 = arith.constant 0 : i32
    %c0_i32_0 = arith.constant 0 : i32
    %c0_i32_1 = arith.constant 0 : i32
    return %c0_i32, %c0_i32_0 : i32, i32
  }
  func.func @transform_5(%arg0: i32) -> (i32, i32) {
    %c0_i32 = arith.constant 0 : i32
    %c0_i32_0 = arith.constant 0 : i32
    %c0_i32_1 = arith.constant 0 : i32
    return %c0_i32, %c0_i32_0 : i32, i32
  }
  func.func @transform_6(%arg0: i32) -> (i32, i32) {
    %c0_i32 = arith.constant 0 : i32
    %c0_i32_0 = arith.constant 0 : i32
    %c0_i32_1 = arith.constant 0 : i32
    return %c0_i32, %c0_i32_0 : i32, i32
  }
  func.func @transform_7(%arg0: i32) -> (i32, i32) {
    %c0_i32 = arith.constant 0 : i32
    %c0_i32_0 = arith.constant 0 : i32
    %c0_i32_1 = arith.constant 0 : i32
    return %c0_i32, %c0_i32_0 : i32, i32
  }
  func.func @transform_8(%arg0: i32) -> (i32, i32) {
    %c0_i32 = arith.constant 0 : i32
    %c0_i32_0 = arith.constant 0 : i32
    %c0_i32_1 = arith.constant 0 : i32
    return %c0_i32, %c0_i32_0 : i32, i32
  }
  func.func @transform_9(%arg0: i32) -> (i32, i32) {
    %c0_i32 = arith.constant 0 : i32
    %c0_i32_0 = arith.constant 0 : i32
    %c0_i32_1 = arith.constant 0 : i32
    return %c0_i32, %c0_i32_0 : i32, i32
  }
  func.func @transform_10(%arg0: i32) -> (i32, i32) {
    %c0_i32 = arith.constant 0 : i32
    %c0_i32_0 = arith.constant 0 : i32
    %c0_i32_1 = arith.constant 0 : i32
    return %c0_i32, %c0_i32_0 : i32, i32
  }
  func.func @transform_11(%arg0: i32) -> (i32, i32) {
    %c0_i32 = arith.constant 0 : i32
    %c0_i32_0 = arith.constant 0 : i32
    %c0_i32_1 = arith.constant 0 : i32
    return %c0_i32, %c0_i32_0 : i32, i32
  }
  func.func @transform_12(%arg0: i32) -> (i32, i32) {
    %c0_i32 = arith.constant 0 : i32
    %c0_i32_0 = arith.constant 0 : i32
    %c0_i32_1 = arith.constant 0 : i32
    return %c0_i32, %c0_i32_0 : i32, i32
  }
  func.func @transform_13(%arg0: i32) -> (i32, i32) {
    %c0_i32 = arith.constant 0 : i32
    %c0_i32_0 = arith.constant 0 : i32
    %c0_i32_1 = arith.constant 0 : i32
    return %c0_i32, %c0_i32_0 : i32, i32
  }
  func.func @transform_14(%arg0: i32) -> (i32, i32) {
    %c0_i32 = arith.constant 0 : i32
    %c0_i32_0 = arith.constant 0 : i32
    return %arg0, %c0_i32 : i32, i32
  }
  func.func @transform_15(%arg0: i32) -> (i32, i32) {
    %c0_i32 = arith.constant 0 : i32
    %c0_i32_0 = arith.constant 0 : i32
    return %arg0, %c0_i32 : i32, i32
  }
}

</mosaic_0001>

<bundles_post_ra>
// kernel: vae_forward.1
= control target key start
LH: loop header
LB: loop body
LE: loop exit
PB: predicated region body
PF: predicated region fallthrough
CT: control target
= control target key end

     0   :  { %s2991_s18 = smov 0   ;;  %s3560_s0 = inlined_call_operand.vmem [shape: bf16[224,256], index: 0, kind: input, shape index: {}]   ;;  %s3561_s1 = inlined_call_operand.vmem [shape: f32[224,16], index: 1, kind: input, shape index: {}]   ;;  %s3562_s2 = inlined_call_operand.vmem [shape: bf16[256,128], index: 2, kind: input, shape index: {}]   ;;  %s3563_s3 = inlined_call_operand.vmem [shape: f32[1,128], index: 3, kind: input, shape index: {}]   ;;  %s3564_s4 = inlined_call_operand.vmem [shape: bf16[128,64], index: 4, kind: input, shape index: {}]   ;;  %s3565_s5 = inlined_call_operand.vmem [shape: f32[1,64], index: 5, kind: input, shape index: {}]   ;;  %s3566_s6 = inlined_call_operand.vmem [shape: bf16[64,32], index: 6, kind: input, shape index: {}]   ;;  %s3567_s7 = inlined_call_operand.vmem [shape: f32[1,32], index: 7, kind: input, shape index: {}]   ;;  %s3568_s8 = inlined_call_operand.vmem [shape: bf16[16,64], index: 8, kind: input, shape index: {}]   ;;  %s3569_s9 = inlined_call_operand.vmem [shape: f32[1,64], index: 9, kind: input, shape index: {}]   ;;  %s3570_s10 = inlined_call_operand.vmem [shape: bf16[64,128], index: 10, kind: input, shape index: {}]   ;;  %s3571_s11 = inlined_call_operand.vmem [shape: f32[1,128], index: 11, kind: input, shape index: {}]   ;;  %s3572_s12 = inlined_call_operand.vmem [shape: bf16[128,256], index: 12, kind: input, shape index: {}]   ;;  %s3573_s13 = inlined_call_operand.vmem [shape: f32[1,256], index: 13, kind: input, shape index: {}]   ;;  %s3574_s14 = inlined_call_operand.vmem [shape: bf16[224,256], index: 14, kind: output, shape index: {0}]   ;;  %s3575_s15 = inlined_call_operand.vmem [shape: f32[224,32], index: 15, kind: output, shape index: {1}]  }
   0x1 LB: > { %s2260_s19 = sadd.s32 4294967295, %s2905_s18   ;;  %p2264_p0 = scmp.ge.s32.totalorder %s2905_s18, 1  ;;  %s2905_s18 = sphi %s2991_s18, %s26_s18  }
   0x2   : > { %p453_p1 = scmp.lt.s32.totalorder %s2905_s18, 3 }
   0x4   : > { %p454_p2 = pnand %p2264_p0, %p453_p1 }
   0x5   : > { %v2681_v0 = vld [vmem:[%s3562_s2 + $0x40] sm:$0xff] (!%p454_p2)   ;;  %s513_s22 = smul.u32 (!%p454_p2), 14, %s2260_s19  ;;  %v2683_v2 = vld [vmem:[%s3562_s2 + $0x48] sm:$0xff] (!%p454_p2)   ;;  %v2907_v3 = vmov (!%p454_p2), 0.0   ;;  %v2685_v5 = vld [vmem:[%s3562_s2 + $0x50] sm:$0xff] (!%p454_p2)   ;;  %vm2908_vm0 = vmmov (!%p454_p2), 0  }
   0x6   : > { %457 = sbr.rel (%p454_p2) target bundleno = 1572 (0x624), region = 76  ;;  %v2682_v1 = vld [vmem:[%s3562_s2] sm:$0xff] (!%p454_p2)   ;;  %2420 = vmatprep.subr.bf16.mxu0 (!%p454_p2), %v2681_v0  ;;  %2523 = vmatprep.subr.bf16.mxu1 (!%p454_p2), %v2907_v3  ;;  %v2684_v4 = vld [vmem:[%s3562_s2 + $0x8] sm:$0xff] (!%p454_p2)   ;;  %v2686_v6 = vld [vmem:[%s3562_s2 + $0x10] sm:$0xff] (!%p454_p2)   ;;  %vm1089_vm1 = vcmask (!%p454_p2), 523264   ;;  %vm2141_vm2 = vcmask (!%p454_p2), 261120  }
   0x7   : > { %2421 = vmatpush3.bf16.msra.mxu0 (!%p454_p2), %v2682_v1  ;;  %p514_p3 = scmp.lt.s32.totalorder (!%p454_p2), %s513_s22, 27  ;;  %v2687_v7 = vld [vmem:[%s3562_s2 + $0x58] sm:$0xff] (!%p454_p2)   ;;  %v2689_v9 = vld [vmem:[%s3562_s2 + $0x60] sm:$0xff] (!%p454_p2)   ;;  %v2691_v11 = vld [vmem:[%s3562_s2 + $0x68] sm:$0xff] (!%p454_p2)   ;;  %2539 = vmatprep.mubr.msk.bf16.mxu1 (!%p454_p2), %vm2908_vm0, %v2907_v3  ;;  %s2909_s28 = smov (!%p454_p2), 112   ;;  %vm1362_vm3 = vcmask (!%p454_p2), 130048  }
   0x8   : > { %2422 = vmatprep.subr.bf16.mxu0 (!%p454_p2), %v2683_v2  ;;  %v2688_v8 = vld [vmem:[%s3562_s2 + $0x18] sm:$0xff] (!%p454_p2)   ;;  %v2690_v10 = vld [vmem:[%s3562_s2 + $0x20] sm:$0xff] (!%p454_p2)   ;;  %v2692_v13 = vld [vmem:[%s3562_s2 + $0x28] sm:$0xff] (!%p454_p2)  }
   0x9   : > { %v2693_v14 = vld [vmem:[%s3562_s2 + $0x70] sm:$0xff] (!%p454_p2)   ;;  %v2695_v16 = vld [vmem:[%s3562_s2 + $0x78] sm:$0xff] (!%p454_p2)   ;;  %v2718_v17 = vld [vmem:[%s3564_s4] sm:$0xff] (!%p454_p2)  }
   0xa   : > { %v2694_v15 = vld [vmem:[%s3562_s2 + $0x30] sm:$0xff] (!%p454_p2)   ;;  %v2696_v18 = vld [vmem:[%s3562_s2 + $0x38] sm:$0xff] (!%p454_p2)   ;;  %2524 = vmatpush3.bf16.msra.mxu1 (!%p454_p2), %v2718_v17  ;;  %v2719_v20 = vld [vmem:[%s3564_s4 + $0x8] sm:$0xff] (!%p454_p2)  }
   0xb   : > { %2423 = vmatpush3.bf16.msra.mxu0 (!%p454_p2), %v2684_v4  ;;  %2525 = vmatprep.subr.bf16.mxu1 (!%p454_p2), %v2907_v3  ;;  %v2720_v22 = vld [vmem:[%s3564_s4 + $0x10] sm:$0xff] (!%p454_p2)   ;;  %v2721_v23 = vld [vmem:[%s3564_s4 + $0x18] sm:$0xff] (!%p454_p2)   ;;  %v2722_v26 = vld [vmem:[%s3564_s4 + $0x20] sm:$0xff] (!%p454_p2)  }
   0xc   : > { %2424 = vmatprep.subr.bf16.mxu0 (!%p454_p2), %v2685_v5  ;;  %v2723_v36 = vld [vmem:[%s3564_s4 + $0x28] sm:$0xff] (!%p454_p2)   ;;  %v2724_v37 = vld [vmem:[%s3564_s4 + $0x30] sm:$0xff] (!%p454_p2)   ;;  %v2725_v38 = vld [vmem:[%s3564_s4 + $0x38] sm:$0xff] (!%p454_p2)  }
   0xd   : > { %s3577_s22 = smov (!%p514_p3, %s513_s22), 27  ;;  %v2726_v39 = vld [vmem:[%s3566_s6] sm:$0xff]   ;;  %v2727_v40 = vld [vmem:[%s3566_s6 + $0x8] sm:$0xff]   ;;  %v2728_v41 = vld [vmem:[%s3566_s6 + $0x10] sm:$0xff]  }
   0xe   : > { %s3024_s24 = sshll.u32 %s3577_s22, 3  ;;  %2526 = vmatpush3.bf16.msra.mxu1 %v2719_v20  ;;  %v2729_v42 = vld [vmem:[%s3566_s6 + $0x18] sm:$0xff]   ;;  %v3126_v44 = vld [vmem:[%s3563_s3] ss:$0 sm:$0xff] }
   0xf   : > { %2425 = vmatpush3.bf16.msra.mxu0 %v2686_v6  ;;  %s3033_s29 = scalar_lea.vmem %s3560_s0, %s3024_s24  ;;  %2527 = vmatprep.subr.bf16.mxu1 %v2907_v3  ;;  %s3208_s27 = scalar_lea.vmem %s3575_s15, %s3024_s24 }
  0x10   : > { %2426 = vmatprep.subr.bf16.mxu0 %v2687_v7  ;;  %v2699_v12 = vld [vmem:[%s3033_s29 + $0x4] ss:$8 sps:$4 sm:$0xff]   ;;  %v2697_v19 = vld [vmem:[%s3033_s29] ss:$8 sps:$4 sm:$0xff]   ;;  %v2700_v21 = vld [vmem:[%s3033_s29 + $0x14] ss:$8 sps:$4 sm:$0xff]   ;;  %s3341_s26 = scalar_lea.vmem %s3561_s1, %s3024_s24 }
  0x11   : > { %791 = vmatprep.mubr.bf16.mxu0 %v2699_v12  ;;  %v2702_v24 = vld [vmem:[%s3033_s29 + $0x10] ss:$8 sps:$4 sm:$0xff]   ;;  %v2703_v25 = vld [vmem:[%s3033_s29 + $0x24] ss:$8 sps:$4 sm:$0xff]   ;;  %v2705_v27 = vld [vmem:[%s3033_s29 + $0x20] ss:$8 sps:$4 sm:$0xff]  }
  0x12   : > { %2528 = vmatpush3.bf16.msra.mxu1 %v2720_v22  ;;  %v2706_v28 = vld [vmem:[%s3033_s29 + $0x34] ss:$8 sps:$4 sm:$0xff]   ;;  %v2708_v29 = vld [vmem:[%s3033_s29 + $0x30] ss:$8 sps:$4 sm:$0xff]   ;;  %v2709_v30 = vld [vmem:[%s3033_s29 + $0x44] ss:$8 sps:$4 sm:$0xff]  }
  0x13   : > { %2427 = vmatpush3.bf16.msra.mxu0 %v2688_v8  ;;  %2529 = vmatprep.subr.bf16.mxu1 %v2907_v3  ;;  %v2711_v31 = vld [vmem:[%s3033_s29 + $0x40] ss:$8 sps:$4 sm:$0xff]   ;;  %v2712_v32 = vld [vmem:[%s3033_s29 + $0x54] ss:$8 sps:$4 sm:$0xff]   ;;  %v2714_v33 = vld [vmem:[%s3033_s29 + $0x50] ss:$8 sps:$4 sm:$0xff]  }
  0x14   : > { %2428 = vmatprep.subr.bf16.mxu0 %v2689_v9  ;;  %v2715_v34 = vld [vmem:[%s3033_s29 + $0x64] ss:$8 sps:$4 sm:$0xff]   ;;  %v2717_v35 = vld [vmem:[%s3033_s29 + $0x60] ss:$8 sps:$4 sm:$0xff]  }
  0x16   : > { %2530 = vmatpush3.bf16.msra.mxu1 %v2721_v23 }
  0x17   : > { %2429 = vmatpush3.bf16.msra.mxu0 %v2690_v10  ;;  %2531 = vmatprep.subr.bf16.mxu1 %v2907_v3 }
  0x18   : > { %2430 = vmatprep.subr.bf16.mxu0 %v2691_v11 }
  0x1a   : > { %2532 = vmatpush3.bf16.msra.mxu1 %v2722_v26 }
  0x1b   : > { %2431 = vmatpush3.bf16.msra.mxu0 %v2692_v13  ;;  %2533 = vmatprep.subr.bf16.mxu1 %v2907_v3 }
  0x1c   : > { %2432 = vmatprep.subr.bf16.mxu0 %v2693_v14 }
  0x1e   : > { %2534 = vmatpush3.bf16.msra.mxu1 %v2723_v36 }
  0x1f   : > { %2433 = vmatpush3.bf16.msra.mxu0 %v2694_v15  ;;  %2535 = vmatprep.subr.bf16.mxu1 %v2907_v3 }
  0x20   : > { %2434 = vmatprep.subr.bf16.mxu0 %v2695_v16 }
  0x22   : > { %2536 = vmatpush3.bf16.msra.mxu1 %v2724_v37 }
  0x23   : > { %2435 = vmatpush3.bf16.msra.mxu0 %v2696_v18  ;;  %2537 = vmatprep.subr.bf16.mxu1 %v2907_v3 }
  0x24   : > { %2567 = vmatprep.subr.bf16.mxu0 %v2907_v3 }
  0x26   : > { %792 = vmatmul.mubr.bf16.vlgmr.msra.gmra.mrb[0].mxu0 %v2697_v19  ;;  %2538 = vmatpush3.bf16.msra.mxu1 %v2725_v38 }
  0x27   : > { %799 = vmatprep.mubr.bf16.mxu0 %v2700_v21  ;;  %2603 = vmatprep.subr.bf16.mxu1 %v2907_v3 }
  0x28   : > { %2568 = vmatpush3.bf16.msra.mxu0 %v2726_v39 }
  0x29   : > { %2569 = vmatprep.subr.bf16.mxu0 %v2907_v3 }
  0x2c   : > { %2570 = vmatpush3.bf16.msra.mxu0 %v2727_v40 }
  0x2d   : > { %2571 = vmatprep.subr.bf16.mxu0 %v2907_v3 }
  0x2e   : > { %800 = vmatmul.mubr.bf16.gmra.mrb[4].mxu0 %v2702_v24 }
  0x2f   : > { %807 = vmatprep.mubr.bf16.mxu0 %v2703_v25 }
  0x30   : > { %2572 = vmatpush3.bf16.msra.mxu0 %v2728_v41 }
  0x31   : > { %2573 = vmatprep.subr.bf16.mxu0 %v2907_v3 }
  0x34   : > { %2574 = vmatpush3.bf16.msra.mxu0 %v2729_v42 }
  0x35   : > { %2633 = vmatprep.subr.bf16.mxu0 %v2907_v3 }
  0x36   : > { %808 = vmatmul.mubr.bf16.gmra.mrb[8].mxu0 %v2705_v27 }
  0x37   : > { %815 = vmatprep.mubr.bf16.mxu0 %v2706_v28 }
  0x3e   : > { %816 = vmatmul.mubr.bf16.gmra.mrb[12].mxu0 %v2708_v29 }
  0x3f   : > { %823 = vmatprep.mubr.bf16.mxu0 %v2709_v30 }
  0x46   : > { %824 = vmatmul.mubr.bf16.gmra.mrb[16].mxu0 %v2711_v31 }
  0x47   : > { %831 = vmatprep.mubr.bf16.mxu0 %v2712_v32 }
  0x4e   : > { %832 = vmatmul.mubr.bf16.gmra.mrb[20].mxu0 %v2714_v33 }
  0x4f   : > { %839 = vmatprep.mubr.bf16.mxu0 %v2715_v34 }
  0x56   : > { %840 = vmatmul.mubr.bf16.gmra.mrb[24].mxu0 %v2717_v35 }
  0x57   : > { %2575 = vmatprep.mubr.msk.bf16.mxu0 %vm2908_vm0, %v2907_v3 }
  0xf9   : > { %v2436_v43 = vpop.f32.mrb[0].mxu0 }
  0xfa   : > { %v2437_v45 = vpop.f32.mrb[1].mxu0 }
  0xfb   : > { %v2438_v46 = vadd.f32 %v2437_v45, %v2436_v43  ;;  %v2439_v47 = vpop.f32.mrb[2].mxu0 }
  0xfc   : > { %v2440_v48 = vpop.f32.mrb[3].mxu0 }
  0xfd   : > { %v794_v49 = vadd.f32 %v2438_v46, %v3126_v44  ;;  %v2441_v50 = vadd.f32 %v2440_v48, %v2439_v47 }
  0xff   : > { %v797_v51 = vadd.f32 %v2441_v50, %v3126_v44  ;;  %v848_v52 = vmax.f32 %v794_v49, 0.0 }
 0x101   : > { %v849_v53 = vmax.f32 %v797_v51, 0.0  ;;  %v2442_v54 = vpop.f32.mrb[4].mxu0 }
 0x102   : > { %v2443_v55 = vpop.f32.mrb[5].mxu0 }
 0x103   : > { %v2444_v56 = vadd.f32 %v2443_v55, %v2442_v54  ;;  %v2445_v57 = vpop.f32.mrb[6].mxu0  ;;  %v862_v58 = vpack.c.bf16 %v849_v53, %v848_v52 }
 0x104   : > { %v2446_v59 = vpop.f32.mrb[7].mxu0 }
 0x105   : > { %v802_v60 = vadd.f32 %v2444_v56, %v3126_v44  ;;  %v2447_v61 = vadd.f32 %v2446_v59, %v2445_v57  ;;  %2540 = vmatmul.mubr.bf16.vlgmr.msra.gmra.mrb[0].mxu1 %v862_v58  ;;  %v3159_v59 = vld [vmem:[%s3565_s5] ss:$0 sm:$0xff] }
 0x106   : > { %2543 = vmatprep.mubr.msk.bf16.mxu1 %vm2908_vm0, %v2907_v3 }
 0x107   : > { %v805_v62 = vadd.f32 %v2447_v61, %v3126_v44  ;;  %v850_v63 = vmax.f32 %v802_v60, 0.0 }
 0x109   : > { %v851_v0 = vmax.f32 %v805_v62, 0.0  ;;  %v2448_v1 = vpop.f32.mrb[8].mxu0 }
 0x10a   : > { %v2449_v2 = vpop.f32.mrb[9].mxu0 }
 0x10b   : > { %v2450_v4 = vadd.f32 %v2449_v2, %v2448_v1  ;;  %v2451_v5 = vpop.f32.mrb[10].mxu0  ;;  %v863_v6 = vpack.c.bf16 %v851_v0, %v850_v63 }
 0x10c   : > { %v2452_v7 = vpop.f32.mrb[11].mxu0 }
 0x10d   : > { %v810_v8 = vadd.f32 %v2450_v4, %v3126_v44  ;;  %v2453_v9 = vadd.f32 %v2452_v7, %v2451_v5  ;;  %2544 = vmatmul.mubr.bf16.gmra.mrb[4].mxu1 %v863_v6 }
 0x10e   : > { %2547 = vmatprep.mubr.msk.bf16.mxu1 %vm2908_vm0, %v2907_v3 }
 0x10f   : > { %v852_v10 = vmax.f32 %v810_v8, 0.0  ;;  %v813_v11 = vadd.f32 %v2453_v9, %v3126_v44 }
 0x111   : > { %v853_v12 = vmax.f32 %v813_v11, 0.0  ;;  %v2454_v13 = vpop.f32.mrb[12].mxu0 }
 0x112   : > { %v2455_v14 = vpop.f32.mrb[13].mxu0 }
 0x113   : > { %v2456_v15 = vadd.f32 %v2455_v14, %v2454_v13  ;;  %v2457_v16 = vpop.f32.mrb[14].mxu0  ;;  %v864_v17 = vpack.c.bf16 %v853_v12, %v852_v10 }
 0x114   : > { %v2458_v18 = vpop.f32.mrb[15].mxu0 }
 0x115   : > { %v818_v19 = vadd.f32 %v2456_v15, %v3126_v44  ;;  %v2459_v20 = vadd.f32 %v2458_v18, %v2457_v16  ;;  %2548 = vmatmul.mubr.bf16.gmra.mrb[8].mxu1 %v864_v17 }
 0x116   : > { %2551 = vmatprep.mubr.msk.bf16.mxu1 %vm2908_vm0, %v2907_v3 }
 0x117   : > { %v854_v21 = vmax.f32 %v818_v19, 0.0  ;;  %v821_v22 = vadd.f32 %v2459_v20, %v3126_v44 }
 0x119   : > { %v855_v23 = vmax.f32 %v821_v22, 0.0  ;;  %v2460_v24 = vpop.f32.mrb[16].mxu0 }
 0x11a   : > { %v2461_v25 = vpop.f32.mrb[17].mxu0 }
 0x11b   : > { %v2462_v26 = vadd.f32 %v2461_v25, %v2460_v24  ;;  %v2463_v27 = vpop.f32.mrb[18].mxu0  ;;  %v865_v28 = vpack.c.bf16 %v855_v23, %v854_v21 }
 0x11c   : > { %v2464_v29 = vpop.f32.mrb[19].mxu0 }
 0x11d   : > { %v826_v30 = vadd.f32 %v2462_v26, %v3126_v44  ;;  %v2465_v31 = vadd.f32 %v2464_v29, %v2463_v27  ;;  %2552 = vmatmul.mubr.bf16.gmra.mrb[12].mxu1 %v865_v28 }
 0x11e   : > { %2555 = vmatprep.mubr.msk.bf16.mxu1 %vm2908_vm0, %v2907_v3 }
 0x11f   : > { %v856_v32 = vmax.f32 %v826_v30, 0.0  ;;  %v829_v33 = vadd.f32 %v2465_v31, %v3126_v44 }
 0x121   : > { %v857_v34 = vmax.f32 %v829_v33, 0.0  ;;  %v2466_v35 = vpop.f32.mrb[20].mxu0 }
 0x122   : > { %v2467_v36 = vpop.f32.mrb[21].mxu0 }
 0x123   : > { %v2468_v37 = vadd.f32 %v2467_v36, %v2466_v35  ;;  %v2469_v38 = vpop.f32.mrb[22].mxu0  ;;  %v866_v39 = vpack.c.bf16 %v857_v34, %v856_v32 }
 0x124   : > { %v2470_v40 = vpop.f32.mrb[23].mxu0 }
 0x125   : > { %v834_v41 = vadd.f32 %v2468_v37, %v3126_v44  ;;  %v2471_v42 = vadd.f32 %v2470_v40, %v2469_v38  ;;  %2556 = vmatmul.mubr.bf16.gmra.mrb[16].mxu1 %v866_v39 }
 0x126   : > { %2559 = vmatprep.mubr.msk.bf16.mxu1 %vm2908_vm0, %v2907_v3 }
 0x127   : > { %v858_v43 = vmax.f32 %v834_v41, 0.0  ;;  %v837_v45 = vadd.f32 %v2471_v42, %v3126_v44 }
 0x129   : > { %v859_v46 = vmax.f32 %v837_v45, 0.0  ;;  %v2472_v47 = vpop.f32.mrb[24].mxu0 }
 0x12a   : > { %v2473_v48 = vpop.f32.mrb[25].mxu0 }
 0x12b   : > { %v2474_v49 = vadd.f32 %v2473_v48, %v2472_v47  ;;  %v2475_v50 = vpop.f32.mrb[26].mxu0  ;;  %v867_v51 = vpack.c.bf16 %v859_v46, %v858_v43 }
 0x12c   : > { %v2476_v52 = vpop.f32.mrb[27].mxu0 }
 0x12d   : > { %v842_v53 = vadd.f32 %v2474_v49, %v3126_v44  ;;  %v2477_v54 = vadd.f32 %v2476_v52, %v2475_v50  ;;  %2560 = vmatmul.mubr.bf16.gmra.mrb[20].mxu1 %v867_v51 }
 0x12e   : > { %2563 = vmatprep.mubr.msk.bf16.mxu1 %vm2908_vm0, %v2907_v3 }
 0x12f   : > { %v860_v55 = vmax.f32 %v842_v53, 0.0  ;;  %v845_v56 = vadd.f32 %v2477_v54, %v3126_v44 }
 0x131   : > { %v861_v57 = vmax.f32 %v845_v56, 0.0 }
 0x133   : > { %v868_v58 = vpack.c.bf16 %v861_v57, %v860_v55 }
 0x135   : > { %2564 = vmatmul.mubr.bf16.gmra.mrb[24].mxu1 %v868_v58 }
 0x136   : > { %2605 = vmatprep.mubr.msk.bf16.mxu1 %vm2908_vm0, %v2907_v3 }
 0x1d8   : > { %v974_v60 = vpop.f32.mrb[0].mxu1 }
 0x1d9   : > { %v975_v61 = vadd.f32 %v3159_v59, %v974_v60  ;;  %v2541_v62 = vpop.f32.mrb[1].mxu1 }
 0x1da   : > { %v977_v63 = vpop.f32.mrb[2].mxu1  ;;  %v3202_v62 = vld [vmem:[%s3567_s7] ss:$0 sm:$0xff] }
 0x1db   : > { %v978_v0 = vadd.f32 %v3159_v59, %v977_v63  ;;  %v2542_v1 = vpop.f32.mrb[3].mxu1  ;;  %v1029_v44 = vmax.f32 %v975_v61, 0.0  ;;  %v2730_v61 = vld [vmem:[%s3568_s8] sm:$0xff]  }
 0x1dc   : > { %2604 = vmatpush3.bf16.msra.mxu1 %v2730_v61 }
 0x1dd   : > { %v1030_v2 = vmax.f32 %v978_v0, 0.0 }
 0x1df   : > { %v1043_v4 = vpack.c.bf16 %v1030_v2, %v1029_v44 }
 0x1e0   : > { %v982_v5 = vpop.f32.mrb[4].mxu1 }
 0x1e1   : > { %v983_v6 = vadd.f32 %v3159_v59, %v982_v5  ;;  %v2545_v7 = vpop.f32.mrb[5].mxu1  ;;  %2576 = vmatmul.mubr.msk.bf16.vlgmr.msra.gmra.mrb[28].mxu0 %vm1089_vm1, %v1043_v4 }
 0x1e2   : > { %v985_v8 = vpop.f32.mrb[6].mxu1  ;;  %2579 = vmatprep.mubr.msk.bf16.mxu0 %vm2908_vm0, %v2907_v3 }
 0x1e3   : > { %v986_v9 = vadd.f32 %v3159_v59, %v985_v8  ;;  %v2546_v10 = vpop.f32.mrb[7].mxu1  ;;  %v1031_v11 = vmax.f32 %v983_v6, 0.0 }
 0x1e5   : > { %v1032_v12 = vmax.f32 %v986_v9, 0.0 }
 0x1e7   : > { %v1044_v13 = vpack.c.bf16 %v1032_v12, %v1031_v11 }
 0x1e8   : > { %v990_v14 = vpop.f32.mrb[8].mxu1 }
 0x1e9   : > { %v991_v15 = vadd.f32 %v3159_v59, %v990_v14  ;;  %v2549_v16 = vpop.f32.mrb[9].mxu1  ;;  %2580 = vmatmul.mubr.msk.bf16.gmra.mrb[32].mxu0 %vm1089_vm1, %v1044_v13 }
 0x1ea   : > { %v993_v17 = vpop.f32.mrb[10].mxu1  ;;  %2583 = vmatprep.mubr.msk.bf16.mxu0 %vm2908_vm0, %v2907_v3 }
 0x1eb   : > { %v994_v18 = vadd.f32 %v3159_v59, %v993_v17  ;;  %v2550_v19 = vpop.f32.mrb[11].mxu1  ;;  %v1033_v20 = vmax.f32 %v991_v15, 0.0 }
 0x1ed   : > { %v1034_v21 = vmax.f32 %v994_v18, 0.0 }
 0x1ef   : > { %v1045_v22 = vpack.c.bf16 %v1034_v21, %v1033_v20 }
 0x1f0   : > { %v998_v23 = vpop.f32.mrb[12].mxu1 }
 0x1f1   : > { %v999_v24 = vadd.f32 %v3159_v59, %v998_v23  ;;  %v2553_v25 = vpop.f32.mrb[13].mxu1  ;;  %2584 = vmatmul.mubr.msk.bf16.gmra.mrb[36].mxu0 %vm1089_vm1, %v1045_v22 }
 0x1f2   : > { %v1001_v26 = vpop.f32.mrb[14].mxu1  ;;  %2587 = vmatprep.mubr.msk.bf16.mxu0 %vm2908_vm0, %v2907_v3 }
 0x1f3   : > { %v1002_v27 = vadd.f32 %v3159_v59, %v1001_v26  ;;  %v2554_v28 = vpop.f32.mrb[15].mxu1  ;;  %v1035_v29 = vmax.f32 %v999_v24, 0.0 }
 0x1f5   : > { %v1036_v30 = vmax.f32 %v1002_v27, 0.0 }
 0x1f7   : > { %v1046_v31 = vpack.c.bf16 %v1036_v30, %v1035_v29 }
 0x1f8   : > { %v1006_v32 = vpop.f32.mrb[16].mxu1 }
 0x1f9   : > { %v1007_v33 = vadd.f32 %v3159_v59, %v1006_v32  ;;  %v2557_v34 = vpop.f32.mrb[17].mxu1  ;;  %2588 = vmatmul.mubr.msk.bf16.gmra.mrb[40].mxu0 %vm1089_vm1, %v1046_v31 }
 0x1fa   : > { %v1009_v35 = vpop.f32.mrb[18].mxu1  ;;  %2591 = vmatprep.mubr.msk.bf16.mxu0 %vm2908_vm0, %v2907_v3 }
 0x1fb   : > { %v1010_v36 = vadd.f32 %v3159_v59, %v1009_v35  ;;  %v2558_v37 = vpop.f32.mrb[19].mxu1  ;;  %v1037_v38 = vmax.f32 %v1007_v33, 0.0 }
 0x1fd   : > { %v1038_v39 = vmax.f32 %v1010_v36, 0.0 }
 0x1ff   : > { %v1047_v40 = vpack.c.bf16 %v1038_v39, %v1037_v38 }
 0x200   : > { %v1014_v41 = vpop.f32.mrb[20].mxu1 }
 0x201   : > { %v1015_v42 = vadd.f32 %v3159_v59, %v1014_v41  ;;  %v2561_v43 = vpop.f32.mrb[21].mxu1  ;;  %2592 = vmatmul.mubr.msk.bf16.gmra.mrb[44].mxu0 %vm1089_vm1, %v1047_v40 }
 0x202   : > { %v1017_v45 = vpop.f32.mrb[22].mxu1  ;;  %2595 = vmatprep.mubr.msk.bf16.mxu0 %vm2908_vm0, %v2907_v3 }
 0x203   : > { %v1018_v46 = vadd.f32 %v3159_v59, %v1017_v45  ;;  %v2562_v47 = vpop.f32.mrb[23].mxu1  ;;  %v1039_v48 = vmax.f32 %v1015_v42, 0.0 }
 0x205   : > { %v1040_v49 = vmax.f32 %v1018_v46, 0.0 }
 0x207   : > { %v1048_v50 = vpack.c.bf16 %v1040_v49, %v1039_v48 }
 0x208   : > { %v1022_v51 = vpop.f32.mrb[24].mxu1 }
 0x209   : > { %v1023_v52 = vadd.f32 %v3159_v59, %v1022_v51  ;;  %v2565_v53 = vpop.f32.mrb[25].mxu1  ;;  %2596 = vmatmul.mubr.msk.bf16.gmra.mrb[48].mxu0 %vm1089_vm1, %v1048_v50 }
 0x20a   : > { %v1025_v54 = vpop.f32.mrb[26].mxu1  ;;  %2599 = vmatprep.mubr.msk.bf16.mxu0 %vm2908_vm0, %v2907_v3 }
 0x20b   : > { %v1026_v55 = vadd.f32 %v3159_v59, %v1025_v54  ;;  %v2566_v56 = vpop.f32.mrb[27].mxu1  ;;  %v1041_v57 = vmax.f32 %v1023_v52, 0.0 }
 0x20d   : > { %v1042_v58 = vmax.f32 %v1026_v55, 0.0 }
 0x20f   : > { %v1049_v60 = vpack.c.bf16 %v1042_v58, %v1041_v57 }
 0x211   : > { %2600 = vmatmul.mubr.msk.bf16.gmra.mrb[52].mxu0 %vm1089_vm1, %v1049_v60 }
 0x212   : > { %2641 = vmatprep.mubr.msk.bf16.mxu0 %vm2908_vm0, %v2907_v3 }
 0x2b4   : > { %v1145_v59 = vpop.f32.mrb[28].mxu0 }
 0x2b5   : > { %v3211_v63 = vadd.f32 %v3202_v62, %v1145_v59  ;;  %v2577_v0 = vpop.f32.mrb[29].mxu0 }
 0x2b6   : > { %v1148_v1 = vpop.f32.mrb[30].mxu0 }
 0x2b7   : > { %v1200_v44 = vmul.f32 0.5, %v3211_v63  ;;  %2142 = vst.msk [vmem:[%s3208_s27] sm:$0xff] %vm2141_vm2, %v3211_v63  ;;  %v3218_v2 = vadd.f32 %v3202_v62, %v1148_v1  ;;  %v2578_v4 = vpop.f32.mrb[31].mxu0 }
 0x2b9   : > { %v1214_v5 = vmul.f32 1.442695, %v1200_v44  ;;  %v1201_v6 = vmul.f32 0.5, %v3218_v2  ;;  %2143 = vst.msk [vmem:[%s3208_s27 + $0x8] sm:$0xff] %vm2141_vm2, %v3218_v2 }
 0x2bb   : > { %2759 = vpow2.f32 %v1214_v5  ;;  %v1216_v7 = vmul.f32 1.442695, %v1201_v6 }
 0x2bc   : > { %v1153_v8 = vpop.f32.mrb[32].mxu0 }
 0x2bd   : > { %v3225_v9 = vadd.f32 %v3202_v62, %v1153_v8  ;;  %v2581_v10 = vpop.f32.mrb[33].mxu0  ;;  %2761 = vpow2.f32 %v1216_v7 }
 0x2be   : > { %v1156_v11 = vpop.f32.mrb[34].mxu0 }
 0x2bf   : > { %v1202_v12 = vmul.f32 0.5, %v3225_v9  ;;  %2144 = vst.msk [vmem:[%s3208_s27 + $0x10] sm:$0xff] %vm2141_vm2, %v3225_v9  ;;  %v3232_v13 = vadd.f32 %v3202_v62, %v1156_v11  ;;  %v2582_v14 = vpop.f32.mrb[35].mxu0 }
 0x2c1   : > { %v1218_v15 = vmul.f32 1.442695, %v1202_v12  ;;  %v1203_v16 = vmul.f32 0.5, %v3232_v13  ;;  %2145 = vst.msk [vmem:[%s3208_s27 + $0x18] sm:$0xff] %vm2141_vm2, %v3232_v13 }
 0x2c3   : > { %2763 = vpow2.f32 %v1218_v15  ;;  %v1220_v17 = vmul.f32 1.442695, %v1203_v16 }
 0x2c4   : > { %v1161_v18 = vpop.f32.mrb[36].mxu0 }
 0x2c5   : > { %v2760_v19 = vpop.eup %2759  ;;  %v3239_v20 = vadd.f32 %v3202_v62, %v1161_v18  ;;  %v2585_v21 = vpop.f32.mrb[37].mxu0  ;;  %2765 = vpow2.f32 %v1220_v17 }
 0x2c6   : > { %1270 = vrot.lane.b32.xlu0 %v2760_v19, %s2909_s28  ;;  %v1164_v22 = vpop.f32.mrb[38].mxu0 }
 0x2c7   : > { %v1204_v23 = vmul.f32 0.5, %v3239_v20  ;;  %2146 = vst.msk [vmem:[%s3208_s27 + $0x20] sm:$0xff] %vm2141_vm2, %v3239_v20  ;;  %v3247_v24 = vadd.f32 %v3202_v62, %v1164_v22  ;;  %v2586_v25 = vpop.f32.mrb[39].mxu0  ;;  %v2762_v26 = vpop.eup %2761 }
 0x2c8   : > { %v2732_v25 = vld [vmem:[%s3570_s10 + $0x8] sm:$0xff]  }
 0x2c9   : > { %v1222_v27 = vmul.f32 1.442695, %v1204_v23  ;;  %v1205_v28 = vmul.f32 0.5, %v3247_v24  ;;  %2147 = vst.msk [vmem:[%s3208_s27 + $0x28] sm:$0xff] %vm2141_vm2, %v3247_v24 }
 0x2ca   : > { %1272 = vrot.lane.b32.xlu0 %v2762_v26, %s2909_s28 }
 0x2cb   : > { %2767 = vpow2.f32 %v1222_v27  ;;  %v1224_v29 = vmul.f32 1.442695, %v1205_v28  ;;  %v2733_v27 = vld [vmem:[%s3570_s10 + $0x10] sm:$0xff]   ;;  %v2734_v28 = vld [vmem:[%s3570_s10 + $0x18] sm:$0xff]  }
 0x2cc   : > { %v1169_v30 = vpop.f32.mrb[40].mxu0 }
 0x2cd   : > { %v2764_v31 = vpop.eup %2763  ;;  %2769 = vpow2.f32 %v1224_v29  ;;  %v3255_v32 = vadd.f32 %v3202_v62, %v1169_v30  ;;  %v2589_v33 = vpop.f32.mrb[41].mxu0  ;;  %v1242_v29 = vld [vmem:[%s3341_s26] sm:$0xff] }
 0x2ce   : > { %1274 = vrot.lane.b32.xlu1 %v2764_v31, %s2909_s28  ;;  %v1172_v34 = vpop.f32.mrb[42].mxu0  ;;  %v1243_v31 = vld [vmem:[%s3341_s26 + $0x8] sm:$0xff] }
 0x2cf   : > { %v1206_v35 = vmul.f32 0.5, %v3255_v32  ;;  %2148 = vst.msk [vmem:[%s3208_s27 + $0x30] sm:$0xff] %vm2141_vm2, %v3255_v32  ;;  %v3263_v36 = vadd.f32 %v3202_v62, %v1172_v34  ;;  %v2590_v37 = vpop.f32.mrb[43].mxu0  ;;  %v2766_v38 = vpop.eup %2765 }
 0x2d1   : > { %v1226_v39 = vmul.f32 1.442695, %v1206_v35  ;;  %v1207_v40 = vmul.f32 0.5, %v3263_v36  ;;  %2149 = vst.msk [vmem:[%s3208_s27 + $0x38] sm:$0xff] %vm2141_vm2, %v3263_v36 }
 0x2d2   : > { %1276 = vrot.lane.b32.xlu1 %v2766_v38, %s2909_s28 }
 0x2d3   : > { %2771 = vpow2.f32 %v1226_v39  ;;  %v1228_v41 = vmul.f32 1.442695, %v1207_v40  ;;  %v1244_v39 = vld [vmem:[%s3341_s26 + $0x10] sm:$0xff] }
 0x2d4   : > { %v1177_v42 = vpop.f32.mrb[44].mxu0 }
 0x2d5   : > { %v2768_v43 = vpop.eup %2767  ;;  %2773 = vpow2.f32 %v1228_v41  ;;  %v3271_v45 = vadd.f32 %v3202_v62, %v1177_v42  ;;  %v2593_v46 = vpop.f32.mrb[45].mxu0  ;;  %v1245_v42 = vld [vmem:[%s3341_s26 + $0x18] sm:$0xff] }
 0x2d6   : > { %1278 = vrot.lane.b32.xlu0 %v2768_v43, %s2909_s28  ;;  %v1180_v47 = vpop.f32.mrb[46].mxu0 }
 0x2d7   : > { %v2770_v48 = vpop.eup %2769  ;;  %v1208_v49 = vmul.f32 0.5, %v3271_v45  ;;  %2150 = vst.msk [vmem:[%s3208_s27 + $0x40] sm:$0xff] %vm2141_vm2, %v3271_v45  ;;  %v3279_v50 = vadd.f32 %v3202_v62, %v1180_v47  ;;  %v2594_v51 = vpop.f32.mrb[47].mxu0 }
 0x2d8   : > { %1280 = vrot.lane.b32.xlu1 %v2770_v48, %s2909_s28  ;;  %v1247_v51 = vld [vmem:[%s3341_s26 + $0x28] sm:$0xff] }
 0x2d9   : > { %v1230_v52 = vmul.f32 1.442695, %v1208_v49  ;;  %v1209_v53 = vmul.f32 0.5, %v3279_v50  ;;  %2151 = vst.msk [vmem:[%s3208_s27 + $0x48] sm:$0xff] %vm2141_vm2, %v3279_v50 }
 0x2db   : > { %2775 = vpow2.f32 %v1230_v52  ;;  %v1232_v54 = vmul.f32 1.442695, %v1209_v53 }
 0x2dc   : > { %v1185_v55 = vpop.f32.mrb[48].mxu0 }
 0x2dd   : > { %v2772_v56 = vpop.eup %2771  ;;  %2777 = vpow2.f32 %v1232_v54  ;;  %v3287_v57 = vadd.f32 %v3202_v62, %v1185_v55  ;;  %v2597_v58 = vpop.f32.mrb[49].mxu0 }
 0x2de   : > { %1282 = vrot.lane.b32.xlu0 %v2772_v56, %s2909_s28  ;;  %v1188_v60 = vpop.f32.mrb[50].mxu0  ;;  %v1248_v58 = vld [vmem:[%s3341_s26 + $0x30] sm:$0xff] }
 0x2df   : > { %v2774_v61 = vpop.eup %2773  ;;  %v1210_v59 = vmul.f32 0.5, %v3287_v57  ;;  %2152 = vst.msk [vmem:[%s3208_s27 + $0x50] sm:$0xff] %vm2141_vm2, %v3287_v57  ;;  %v3295_v0 = vadd.f32 %v3202_v62, %v1188_v60  ;;  %v2598_v1 = vpop.f32.mrb[51].mxu0  ;;  %v1249_v60 = vld [vmem:[%s3341_s26 + $0x38] sm:$0xff] }
 0x2e0   : > { %1284 = vrot.lane.b32.xlu1 %v2774_v61, %s2909_s28 }
 0x2e1   : > { %v1234_v44 = vmul.f32 1.442695, %v1210_v59  ;;  %v1211_v4 = vmul.f32 0.5, %v3295_v0  ;;  %2153 = vst.msk [vmem:[%s3208_s27 + $0x58] sm:$0xff] %vm2141_vm2, %v3295_v0 }
 0x2e3   : > { %2779 = vpow2.f32 %v1234_v44  ;;  %v1236_v5 = vmul.f32 1.442695, %v1211_v4 }
 0x2e4   : > { %v1193_v6 = vpop.f32.mrb[52].mxu0 }
 0x2e5   : > { %v2776_v7 = vpop.eup %2775  ;;  %2781 = vpow2.f32 %v1236_v5  ;;  %v3303_v8 = vadd.f32 %v3202_v62, %v1193_v6  ;;  %v2601_v10 = vpop.f32.mrb[53].mxu0  ;;  %v1250_v5 = vld [vmem:[%s3341_s26 + $0x40] sm:$0xff]  ;;  %v1251_v6 = vld [vmem:[%s3341_s26 + $0x48] sm:$0xff] }
 0x2e6   : > { %1286 = vrot.lane.b32.xlu0 %v2776_v7, %s2909_s28  ;;  %v1196_v11 = vpop.f32.mrb[54].mxu0 }
 0x2e7   : > { %v2778_v12 = vpop.eup %2777  ;;  %v1212_v14 = vmul.f32 0.5, %v3303_v8  ;;  %2154 = vst.msk [vmem:[%s3208_s27 + $0x60] sm:$0xff] %vm2141_vm2, %v3303_v8  ;;  %v3311_v15 = vadd.f32 %v3202_v62, %v1196_v11  ;;  %v2602_v16 = vpop.f32.mrb[55].mxu0  ;;  %v2731_v62 = vld [vmem:[%s3570_s10] sm:$0xff]  }
 0x2e8   : > { %1288 = vrot.lane.b32.xlu1 %v2778_v12, %s2909_s28  ;;  %2634 = vmatpush3.bf16.msra.mxu0 %v2731_v62  ;;  %v1252_v16 = vld [vmem:[%s3341_s26 + $0x50] sm:$0xff] }
 0x2e9   : > { %v1238_v17 = vmul.f32 1.442695, %v1212_v14  ;;  %v1213_v18 = vmul.f32 0.5, %v3311_v15  ;;  %2155 = vst.msk [vmem:[%s3208_s27 + $0x68] sm:$0xff] %vm2141_vm2, %v3311_v15  ;;  %2635 = vmatprep.subr.bf16.mxu0 %v2907_v3 }
 0x2eb   : > { %2783 = vpow2.f32 %v1238_v17  ;;  %v1240_v19 = vmul.f32 1.442695, %v1213_v18  ;;  %v1253_v17 = vld [vmem:[%s3341_s26 + $0x58] sm:$0xff] }
 0x2ec   : > { %2636 = vmatpush3.bf16.msra.mxu0 %v2732_v25  ;;  %v1254_v25 = vld [vmem:[%s3341_s26 + $0x60] sm:$0xff] }
 0x2ed   : > { %v2780_v21 = vpop.eup %2779  ;;  %2785 = vpow2.f32 %v1240_v19  ;;  %2637 = vmatprep.subr.bf16.mxu0 %v2907_v3 }
 0x2ee   : > { %1290 = vrot.lane.b32.xlu0 %v2780_v21, %s2909_s28 }
 0x2ef   : > { %v2782_v22 = vpop.eup %2781 }
 0x2f0   : > { %1292 = vrot.lane.b32.xlu1 %v2782_v22, %s2909_s28  ;;  %2638 = vmatpush3.bf16.msra.mxu0 %v2733_v27 }
 0x2f1   : > { %2639 = vmatprep.subr.bf16.mxu0 %v2907_v3 }
 0x2f4   : > { %2640 = vmatpush3.bf16.msra.mxu0 %v2734_v28 }
 0x2f5   : > { %v2784_v23 = vpop.eup %2783 }
 0x2f6   : > { %1294 = vrot.lane.b32.xlu0 %v2784_v23, %s2909_s28 }
 0x2f7   : > { %v2786_v26 = vpop.eup %2785 }
 0x2f8   : > { %1296 = vrot.lane.b32.xlu1 %v2786_v26, %s2909_s28  ;;  %v1255_v26 = vld [vmem:[%s3341_s26 + $0x68] sm:$0xff]  ;;  %s3529_s28 = scalar_lea.vmem %s3574_s14, %s3024_s24 }
 0x338   : > { %v1271_v30 = vpop.permute.xlu0 %1270 }
 0x339   : > { %v1312_v33 = vmul.f32 %v1271_v30, %v1242_v29 }
 0x33b   : > { %v1326_v37 = vadd.f32 %v1312_v33, %v3211_v63 }
 0x33c   : > { %v1273_v34 = vpop.permute.xlu0 %1272 }
 0x33d   : > { %v1313_v35 = vmul.f32 %v1273_v34, %v1243_v31  ;;  %v2740_v34 = vld [vmem:[%s3572_s12 + $0x14] ss:$8 sps:$4 sm:$0xff]  }
 0x33f   : > { %v1327_v38 = vadd.f32 %v1313_v35, %v3218_v2  ;;  %v1246_v2 = vld [vmem:[%s3341_s26 + $0x20] sm:$0xff] }
 0x340   : > { %v1275_v40 = vpop.permute.xlu1 %1274  ;;  %v2741_v35 = vld [vmem:[%s3572_s12 + $0x20] ss:$8 sps:$4 sm:$0xff]  }
 0x341   : > { %v1340_v41 = vpack.c.bf16 %v1327_v38, %v1326_v37  ;;  %v1314_v43 = vmul.f32 %v1275_v40, %v1244_v39  ;;  %v2746_v37 = vld [vmem:[%s3572_s12 + $0x34] ss:$8 sps:$4 sm:$0xff]   ;;  %v2744_v38 = vld [vmem:[%s3572_s12 + $0x30] ss:$8 sps:$4 sm:$0xff]   ;;  %v2749_v39 = vld [vmem:[%s3572_s12 + $0x44] ss:$8 sps:$4 sm:$0xff]  }
 0x342   : > { %v2747_v40 = vld [vmem:[%s3572_s12 + $0x40] ss:$8 sps:$4 sm:$0xff]  }
 0x343   : > { %2606 = vmatmul.mubr.msk.bf16.vlgmr.msra.gmra.mrb[28].mxu1 %vm1362_vm3, %v1340_v41  ;;  %v1328_v63 = vadd.f32 %v1314_v43, %v3225_v9  ;;  %v2752_v41 = vld [vmem:[%s3572_s12 + $0x54] ss:$8 sps:$4 sm:$0xff]   ;;  %v2755_v43 = vld [vmem:[%s3572_s12 + $0x64] ss:$8 sps:$4 sm:$0xff]  }
 0x344   : > { %v1277_v46 = vpop.permute.xlu1 %1276  ;;  %2609 = vmatprep.mubr.msk.bf16.mxu1 %vm2908_vm0, %v2907_v3 }
 0x345   : > { %v1315_v47 = vmul.f32 %v1277_v46, %v1245_v42  ;;  %v2750_v42 = vld [vmem:[%s3572_s12 + $0x50] ss:$8 sps:$4 sm:$0xff]   ;;  %v2753_v46 = vld [vmem:[%s3572_s12 + $0x60] ss:$8 sps:$4 sm:$0xff]  }
 0x347   : > { %v1329_v48 = vadd.f32 %v1315_v47, %v3232_v13  ;;  %v3435_v47 = vld [vmem:[%s3569_s9] ss:$0 sm:$0xff] }
 0x348   : > { %v1279_v49 = vpop.permute.xlu0 %1278 }
 0x349   : > { %v1341_v52 = vpack.c.bf16 %v1329_v48, %v1328_v63  ;;  %v1316_v54 = vmul.f32 %v1279_v49, %v1246_v2 }
 0x34a   : > { %v1281_v53 = vpop.permute.xlu1 %1280 }
 0x34b   : > { %v1317_v55 = vmul.f32 %v1281_v53, %v1247_v51  ;;  %2610 = vmatmul.mubr.msk.bf16.gmra.mrb[32].mxu1 %vm1362_vm3, %v1341_v52  ;;  %v1330_v9 = vadd.f32 %v1316_v54, %v3239_v20 }
 0x34c   : > { %2613 = vmatprep.mubr.msk.bf16.mxu1 %vm2908_vm0, %v2907_v3 }
 0x34d   : > { %v1331_v56 = vadd.f32 %v1317_v55, %v3247_v24 }
 0x34f   : > { %v1342_v61 = vpack.c.bf16 %v1331_v56, %v1330_v9 }
 0x350   : > { %v1283_v13 = vpop.permute.xlu0 %1282 }
 0x351   : > { %v1318_v1 = vmul.f32 %v1283_v13, %v1248_v58 }
 0x352   : > { %v1285_v59 = vpop.permute.xlu1 %1284 }
 0x353   : > { %v1319_v44 = vmul.f32 %v1285_v59, %v1249_v60  ;;  %2614 = vmatmul.mubr.msk.bf16.gmra.mrb[36].mxu1 %vm1362_vm3, %v1342_v61  ;;  %v1332_v24 = vadd.f32 %v1318_v1, %v3255_v32 }
 0x354   : > { %2617 = vmatprep.mubr.msk.bf16.mxu1 %vm2908_vm0, %v2907_v3 }
 0x355   : > { %v1333_v4 = vadd.f32 %v1319_v44, %v3263_v36 }
 0x357   : > { %v1343_v7 = vpack.c.bf16 %v1333_v4, %v1332_v24 }
 0x358   : > { %v1287_v20 = vpop.permute.xlu0 %1286 }
 0x359   : > { %v1320_v11 = vmul.f32 %v1287_v20, %v1250_v5 }
 0x35a   : > { %v1289_v10 = vpop.permute.xlu1 %1288 }
 0x35b   : > { %v1321_v12 = vmul.f32 %v1289_v10, %v1251_v6  ;;  %2618 = vmatmul.mubr.msk.bf16.gmra.mrb[40].mxu1 %vm1362_vm3, %v1343_v7  ;;  %v1334_v36 = vadd.f32 %v1320_v11, %v3271_v45 }
 0x35c   : > { %2621 = vmatprep.mubr.msk.bf16.mxu1 %vm2908_vm0, %v2907_v3 }
 0x35d   : > { %v1335_v14 = vadd.f32 %v1321_v12, %v3279_v50 }
 0x35f   : > { %v1344_v18 = vpack.c.bf16 %v1335_v14, %v1334_v36 }
 0x360   : > { %v1291_v32 = vpop.permute.xlu0 %1290 }
 0x361   : > { %v1322_v21 = vmul.f32 %v1291_v32, %v1252_v16 }
 0x362   : > { %v1293_v19 = vpop.permute.xlu1 %1292 }
 0x363   : > { %v1323_v22 = vmul.f32 %v1293_v19, %v1253_v17  ;;  %2622 = vmatmul.mubr.msk.bf16.gmra.mrb[44].mxu1 %vm1362_vm3, %v1344_v18  ;;  %v1336_v23 = vadd.f32 %v1322_v21, %v3287_v57  ;;  %v2735_v57 = vld [vmem:[%s3572_s12] ss:$8 sps:$4 sm:$0xff]  }
 0x364   : > { %2625 = vmatprep.mubr.msk.bf16.mxu1 %vm2908_vm0, %v2907_v3 }
 0x365   : > { %v1337_v62 = vadd.f32 %v1323_v22, %v3295_v0  ;;  %v2737_v0 = vld [vmem:[%s3572_s12 + $0x4] ss:$8 sps:$4 sm:$0xff]  }
 0x366   : > { %1772 = vmatprep.subr.bf16.mxu1 %v2737_v0 }
 0x367   : > { %v1345_v45 = vpack.c.bf16 %v1337_v62, %v1336_v23  ;;  %1773 = vmatpush1.bf16.msra.mxu1 %v2735_v57 }
 0x368   : > { %v1295_v50 = vpop.permute.xlu0 %1294  ;;  %1774 = vmatprep.subr.bf16.mxu1 %v2740_v34 }
 0x369   : > { %v1324_v28 = vmul.f32 %v1295_v50, %v1254_v25 }
 0x36a   : > { %v1297_v27 = vpop.permute.xlu1 %1296 }
 0x36b   : > { %v1325_v29 = vmul.f32 %v1297_v27, %v1255_v26  ;;  %2626 = vmatmul.mubr.msk.bf16.gmra.mrb[48].mxu1 %vm1362_vm3, %v1345_v45  ;;  %v1338_v31 = vadd.f32 %v1324_v28, %v3303_v8  ;;  %v2738_v8 = vld [vmem:[%s3572_s12 + $0x10] ss:$8 sps:$4 sm:$0xff]  }
 0x36c   : > { %2629 = vmatprep.mubr.msk.bf16.mxu1 %vm2908_vm0, %v2907_v3  ;;  %1775 = vmatpush1.bf16.msra.mxu1 %v2738_v8 }
 0x36d   : > { %v1339_v30 = vadd.f32 %v1325_v29, %v3311_v15  ;;  %v2743_v15 = vld [vmem:[%s3572_s12 + $0x24] ss:$8 sps:$4 sm:$0xff]  }
 0x36e   : > { %1776 = vmatprep.subr.bf16.mxu1 %v2743_v15 }
 0x36f   : > { %v1346_v33 = vpack.c.bf16 %v1339_v30, %v1338_v31 }
 0x370   : > { %1777 = vmatpush1.bf16.msra.mxu1 %v2741_v35 }
 0x371   : > { %1778 = vmatprep.subr.bf16.mxu1 %v2746_v37 }
 0x373   : > { %2630 = vmatmul.mubr.msk.bf16.gmra.mrb[52].mxu1 %vm1362_vm3, %v1346_v33 }
 0x374   : > { %1779 = vmatpush1.bf16.msra.mxu1 %v2744_v38 }
 0x375   : > { %1780 = vmatprep.subr.bf16.mxu1 %v2749_v39 }
 0x378   : > { %1781 = vmatpush1.bf16.msra.mxu1 %v2747_v40 }
 0x379   : > { %1782 = vmatprep.subr.bf16.mxu1 %v2752_v41 }
 0x37c   : > { %1783 = vmatpush1.bf16.msra.mxu1 %v2750_v42 }
 0x37d   : > { %1784 = vmatprep.subr.bf16.mxu1 %v2755_v43 }
 0x380   : > { %1785 = vmatpush1.bf16.msra.mxu1 %v2753_v46 }
 0x416   : > { %v1418_v63 = vpop.f32.mrb[28].mxu1 }
 0x417   : > { %v1419_v48 = vadd.f32 %v3435_v47, %v1418_v63  ;;  %v2607_v2 = vpop.f32.mrb[29].mxu1 }
 0x418   : > { %v1421_v49 = vpop.f32.mrb[30].mxu1  ;;  %v2758_v2 = vld [vmem:[%s3572_s12 + $0x74] ss:$8 sps:$4 sm:$0xff]  }
 0x419   : > { %v1422_v51 = vadd.f32 %v3435_v47, %v1421_v49  ;;  %v2608_v52 = vpop.f32.mrb[31].mxu1  ;;  %v1473_v53 = vmax.f32 %v1419_v48, 0.0  ;;  %v2756_v48 = vld [vmem:[%s3572_s12 + $0x70] ss:$8 sps:$4 sm:$0xff]   ;;  %1786 = vmatprep.subr.bf16.mxu1 %v2758_v2  ;;  %v2910_v49 = vmov 0  }
 0x41a   : > { %1787 = vmatpush1.bf16.msra.mxu1 %v2756_v48  ;;  %1804 = vmatprep.mubr.bf16.mxu1 %v2910_v49 }
 0x41b   : > { %v1474_v54 = vmax.f32 %v1422_v51, 0.0 }
 0x41d   : > { %v1487_v55 = vpack.c.bf16 %v1474_v54, %v1473_v53 }
 0x41e   : > { %v1426_v56 = vpop.f32.mrb[32].mxu1 }
 0x41f   : > { %v1427_v9 = vadd.f32 %v3435_v47, %v1426_v56  ;;  %v2611_v58 = vpop.f32.mrb[33].mxu1  ;;  %2642 = vmatmul.mubr.msk.bf16.vlgmr.msra.gmra.mrb[56].mxu0 %vm1089_vm1, %v1487_v55 }
 0x420   : > { %v1429_v13 = vpop.f32.mrb[34].mxu1  ;;  %2645 = vmatprep.mubr.msk.bf16.mxu0 %vm2908_vm0, %v2907_v3 }
 0x421   : > { %v1430_v60 = vadd.f32 %v3435_v47, %v1429_v13  ;;  %v2612_v61 = vpop.f32.mrb[35].mxu1  ;;  %v1475_v59 = vmax.f32 %v1427_v9, 0.0 }
 0x423   : > { %v1476_v1 = vmax.f32 %v1430_v60, 0.0 }
 0x425   : > { %v1488_v44 = vpack.c.bf16 %v1476_v1, %v1475_v59 }
 0x426   : > { %v1434_v4 = vpop.f32.mrb[36].mxu1 }
 0x427   : > { %v1435_v24 = vadd.f32 %v3435_v47, %v1434_v4  ;;  %v2615_v5 = vpop.f32.mrb[37].mxu1  ;;  %2646 = vmatmul.mubr.msk.bf16.gmra.mrb[60].mxu0 %vm1089_vm1, %v1488_v44 }
 0x428   : > { %v1437_v20 = vpop.f32.mrb[38].mxu1  ;;  %2649 = vmatprep.mubr.msk.bf16.mxu0 %vm2908_vm0, %v2907_v3 }
 0x429   : > { %v1438_v6 = vadd.f32 %v3435_v47, %v1437_v20  ;;  %v2616_v7 = vpop.f32.mrb[39].mxu1  ;;  %v1477_v10 = vmax.f32 %v1435_v24, 0.0 }
 0x42b   : > { %v1478_v11 = vmax.f32 %v1438_v6, 0.0 }
 0x42d   : > { %v1489_v12 = vpack.c.bf16 %v1478_v11, %v1477_v10 }
 0x42e   : > { %v1442_v14 = vpop.f32.mrb[40].mxu1 }
 0x42f   : > { %v1443_v36 = vadd.f32 %v3435_v47, %v1442_v14  ;;  %v2619_v16 = vpop.f32.mrb[41].mxu1  ;;  %2650 = vmatmul.mubr.msk.bf16.gmra.mrb[64].mxu0 %vm1089_vm1, %v1489_v12 }
 0x430   : > { %v1445_v32 = vpop.f32.mrb[42].mxu1  ;;  %2653 = vmatprep.mubr.msk.bf16.mxu0 %vm2908_vm0, %v2907_v3 }
 0x431   : > { %v1446_v17 = vadd.f32 %v3435_v47, %v1445_v32  ;;  %v2620_v18 = vpop.f32.mrb[43].mxu1  ;;  %v1479_v19 = vmax.f32 %v1443_v36, 0.0 }
 0x433   : > { %v1480_v21 = vmax.f32 %v1446_v17, 0.0 }
 0x435   : > { %v1490_v22 = vpack.c.bf16 %v1480_v21, %v1479_v19 }
 0x436   : > { %v1450_v62 = vpop.f32.mrb[44].mxu1 }
 0x437   : > { %v1451_v23 = vadd.f32 %v3435_v47, %v1450_v62  ;;  %v2623_v25 = vpop.f32.mrb[45].mxu1  ;;  %2654 = vmatmul.mubr.msk.bf16.gmra.mrb[68].mxu0 %vm1089_vm1, %v1490_v22 }
 0x438   : > { %v1453_v50 = vpop.f32.mrb[46].mxu1  ;;  %2657 = vmatprep.mubr.msk.bf16.mxu0 %vm2908_vm0, %v2907_v3 }
 0x439   : > { %v1454_v26 = vadd.f32 %v3435_v47, %v1453_v50  ;;  %v2624_v45 = vpop.f32.mrb[47].mxu1  ;;  %v1481_v27 = vmax.f32 %v1451_v23, 0.0 }
 0x43b   : > { %v1482_v28 = vmax.f32 %v1454_v26, 0.0 }
 0x43d   : > { %v1491_v29 = vpack.c.bf16 %v1482_v28, %v1481_v27 }
 0x43e   : > { %v1458_v30 = vpop.f32.mrb[48].mxu1 }
 0x43f   : > { %v1459_v31 = vadd.f32 %v3435_v47, %v1458_v30  ;;  %v2627_v33 = vpop.f32.mrb[49].mxu1  ;;  %2658 = vmatmul.mubr.msk.bf16.gmra.mrb[72].mxu0 %vm1089_vm1, %v1491_v29 }
 0x440   : > { %v1461_v57 = vpop.f32.mrb[50].mxu1  ;;  %2661 = vmatprep.mubr.msk.bf16.mxu0 %vm2908_vm0, %v2907_v3 }
 0x441   : > { %v1462_v0 = vadd.f32 %v3435_v47, %v1461_v57  ;;  %v2628_v34 = vpop.f32.mrb[51].mxu1  ;;  %v1483_v8 = vmax.f32 %v1459_v31, 0.0 }
 0x443   : > { %v1484_v15 = vmax.f32 %v1462_v0, 0.0 }
 0x445   : > { %v1492_v35 = vpack.c.bf16 %v1484_v15, %v1483_v8 }
 0x446   : > { %v1466_v37 = vpop.f32.mrb[52].mxu1 }
 0x447   : > { %v1467_v38 = vadd.f32 %v3435_v47, %v1466_v37  ;;  %v2631_v39 = vpop.f32.mrb[53].mxu1  ;;  %2662 = vmatmul.mubr.msk.bf16.gmra.mrb[76].mxu0 %vm1089_vm1, %v1492_v35 }
 0x448   : > { %v1469_v40 = vpop.f32.mrb[54].mxu1  ;;  %2665 = vmatprep.mubr.msk.bf16.mxu0 %vm2908_vm0, %v2907_v3  ;;  %v3480_v3 = vld [vmem:[%s3571_s11] ss:$0 sm:$0xff] }
 0x449   : > { %v1470_v41 = vadd.f32 %v3435_v47, %v1469_v40  ;;  %v2632_v42 = vpop.f32.mrb[55].mxu1  ;;  %v1485_v43 = vmax.f32 %v1467_v38, 0.0 }
 0x44b   : > { %v1486_v46 = vmax.f32 %v1470_v41, 0.0 }
 0x44d   : > { %v1493_v63 = vpack.c.bf16 %v1486_v46, %v1485_v43 }
 0x44f   : > { %2666 = vmatmul.mubr.msk.bf16.gmra.mrb[80].mxu0 %vm1089_vm1, %v1493_v63 }
 0x4f2   : > { %v1588_v47 = vpop.f32.mrb[56].mxu0 }
 0x4f3   : > { %v1589_v51 = vadd.f32 %v3480_v3, %v1588_v47  ;;  %v2643_v52 = vpop.f32.mrb[57].mxu0 }
 0x4f4   : > { %v1591_v53 = vpop.f32.mrb[58].mxu0 }
 0x4f5   : > { %v1592_v54 = vadd.f32 %v3480_v3, %v1591_v53  ;;  %v2644_v55 = vpop.f32.mrb[59].mxu0  ;;  %v1643_v56 = vmax.f32 %v1589_v51, 0.0  ;;  %v1682_v51 = vlaneseq }
 0x4f7   : > { %v1644_v9 = vmax.f32 %v1592_v54, 0.0  ;;  %v1683_v52 = vshrl.u32 %v1682_v51, 7  ;;  %v1680_v54 = vld [vmem:[%s3573_s13] sm:$0x3] }
 0x4f9   : > { %v1657_v58 = vpack.c.bf16 %v1644_v9, %v1643_v56  ;;  %v1684_v53 = vsub.s32 0, %v1683_v52  ;;  %v1688_v55 = vsub.s32 1, %v1683_v52 }
 0x4fa   : > { %v1596_v13 = vpop.f32.mrb[60].mxu0 }
 0x4fb   : > { %v1597_v60 = vadd.f32 %v3480_v3, %v1596_v13  ;;  %v2647_v61 = vpop.f32.mrb[61].mxu0  ;;  %1805 = vmatmul.mubr.bf16.vlgmr.msra.gmra.mrb[56].mxu1 %v1657_v58  ;;  %v3505_v56 = vrot.slane %v1680_v54, %v1684_v53  ;;  %v3507_v9 = vrot.slane %v1680_v54, %v1688_v55 }
 0x4fc   : > { %v1599_v59 = vpop.f32.mrb[62].mxu0  ;;  %1814 = vmatprep.mubr.bf16.mxu1 %v2910_v49 }
 0x4fd   : > { %v1600_v1 = vadd.f32 %v3480_v3, %v1599_v59  ;;  %v2648_v44 = vpop.f32.mrb[63].mxu0  ;;  %v1645_v4 = vmax.f32 %v1597_v60, 0.0 }
 0x4ff   : > { %v1646_v24 = vmax.f32 %v1600_v1, 0.0 }
 0x501   : > { %v1658_v5 = vpack.c.bf16 %v1646_v24, %v1645_v4 }
 0x502   : > { %v1604_v20 = vpop.f32.mrb[64].mxu0 }
 0x503   : > { %v1605_v6 = vadd.f32 %v3480_v3, %v1604_v20  ;;  %v2651_v7 = vpop.f32.mrb[65].mxu0  ;;  %1815 = vmatmul.mubr.bf16.gmra.mrb[60].mxu1 %v1658_v5 }
 0x504   : > { %v1607_v10 = vpop.f32.mrb[66].mxu0  ;;  %1824 = vmatprep.mubr.bf16.mxu1 %v2910_v49 }
 0x505   : > { %v1608_v11 = vadd.f32 %v3480_v3, %v1607_v10  ;;  %v2652_v12 = vpop.f32.mrb[67].mxu0  ;;  %v1647_v14 = vmax.f32 %v1605_v6, 0.0 }
 0x507   : > { %v1648_v36 = vmax.f32 %v1608_v11, 0.0 }
 0x509   : > { %v1659_v16 = vpack.c.bf16 %v1648_v36, %v1647_v14 }
 0x50a   : > { %v1612_v32 = vpop.f32.mrb[68].mxu0 }
 0x50b   : > { %v1613_v17 = vadd.f32 %v3480_v3, %v1612_v32  ;;  %v2655_v18 = vpop.f32.mrb[69].mxu0  ;;  %1825 = vmatmul.mubr.bf16.gmra.mrb[64].mxu1 %v1659_v16 }
 0x50c   : > { %v1615_v19 = vpop.f32.mrb[70].mxu0  ;;  %1834 = vmatprep.mubr.bf16.mxu1 %v2910_v49 }
 0x50d   : > { %v1616_v21 = vadd.f32 %v3480_v3, %v1615_v19  ;;  %v2656_v22 = vpop.f32.mrb[71].mxu0  ;;  %v1649_v62 = vmax.f32 %v1613_v17, 0.0 }
 0x50f   : > { %v1650_v23 = vmax.f32 %v1616_v21, 0.0 }
 0x511   : > { %v1660_v25 = vpack.c.bf16 %v1650_v23, %v1649_v62 }
 0x512   : > { %v1620_v50 = vpop.f32.mrb[72].mxu0 }
 0x513   : > { %v1621_v26 = vadd.f32 %v3480_v3, %v1620_v50  ;;  %v2659_v45 = vpop.f32.mrb[73].mxu0  ;;  %1835 = vmatmul.mubr.bf16.gmra.mrb[68].mxu1 %v1660_v25 }
 0x514   : > { %v1623_v27 = vpop.f32.mrb[74].mxu0  ;;  %1844 = vmatprep.mubr.bf16.mxu1 %v2910_v49 }
 0x515   : > { %v1624_v28 = vadd.f32 %v3480_v3, %v1623_v27  ;;  %v2660_v29 = vpop.f32.mrb[75].mxu0  ;;  %v1651_v30 = vmax.f32 %v1621_v26, 0.0 }
 0x517   : > { %v1652_v31 = vmax.f32 %v1624_v28, 0.0 }
 0x519   : > { %v1661_v33 = vpack.c.bf16 %v1652_v31, %v1651_v30 }
 0x51a   : > { %v1628_v57 = vpop.f32.mrb[76].mxu0 }
 0x51b   : > { %v1629_v0 = vadd.f32 %v3480_v3, %v1628_v57  ;;  %v2663_v34 = vpop.f32.mrb[77].mxu0  ;;  %1845 = vmatmul.mubr.bf16.gmra.mrb[72].mxu1 %v1661_v33 }
 0x51c   : > { %v1631_v8 = vpop.f32.mrb[78].mxu0  ;;  %1854 = vmatprep.mubr.bf16.mxu1 %v2910_v49 }
 0x51d   : > { %v1632_v15 = vadd.f32 %v3480_v3, %v1631_v8  ;;  %v2664_v35 = vpop.f32.mrb[79].mxu0  ;;  %v1653_v37 = vmax.f32 %v1629_v0, 0.0 }
 0x51f   : > { %v1654_v38 = vmax.f32 %v1632_v15, 0.0 }
 0x521   : > { %v1662_v39 = vpack.c.bf16 %v1654_v38, %v1653_v37 }
 0x522   : > { %v1636_v40 = vpop.f32.mrb[80].mxu0 }
 0x523   : > { %v1637_v41 = vadd.f32 %v3480_v3, %v1636_v40  ;;  %v2667_v42 = vpop.f32.mrb[81].mxu0  ;;  %1855 = vmatmul.mubr.bf16.gmra.mrb[76].mxu1 %v1662_v39 }
 0x524   : > { %v1639_v43 = vpop.f32.mrb[82].mxu0  ;;  %1864 = vmatprep.mubr.bf16.mxu1 %v2910_v49 }
 0x525   : > { %v1640_v46 = vadd.f32 %v3480_v3, %v1639_v43  ;;  %v2668_v63 = vpop.f32.mrb[83].mxu0  ;;  %v1655_v48 = vmax.f32 %v1637_v41, 0.0 }
 0x527   : > { %v1656_v2 = vmax.f32 %v1640_v46, 0.0 }
 0x529   : > { %v1663_v47 = vpack.c.bf16 %v1656_v2, %v1655_v48 }
 0x52b   : > { %1865 = vmatmul.mubr.bf16.gmra.mrb[80].mxu1 %v1663_v47 }
 0x5ce   : > { %v1806_v49 = vpop.f32.mrb[56].mxu1 }
 0x5cf   : > { %v1807_v3 = vadd.f32 %v1806_v49, %v3505_v56  ;;  %v1808_v58 = vpop.f32.mrb[57].mxu1 }
 0x5d0   : > { %v1809_v13 = vadd.f32 %v1808_v58, %v3507_v9  ;;  %v1810_v60 = vpop.f32.mrb[58].mxu1 }
 0x5d1   : > { %v2360_v61 = vmul.f32 -1.442695, %v1807_v3  ;;  %v1811_v59 = vadd.f32 %v1810_v60, %v3505_v56  ;;  %v1812_v1 = vpop.f32.mrb[59].mxu1 }
 0x5d2   : > { %v2361_v44 = vmul.f32 -1.442695, %v1809_v13  ;;  %v1813_v4 = vadd.f32 %v1812_v1, %v3507_v9 }
 0x5d3   : > { %2787 = vpow2.f32 %v2360_v61  ;;  %v2362_v24 = vmul.f32 -1.442695, %v1811_v59 }
 0x5d4   : > { %2789 = vpow2.f32 %v2361_v44  ;;  %v2363_v5 = vmul.f32 -1.442695, %v1813_v4 }
 0x5d5   : > { %2791 = vpow2.f32 %v2362_v24 }
 0x5d6   : > { %2793 = vpow2.f32 %v2363_v5  ;;  %v1816_v20 = vpop.f32.mrb[60].mxu1 }
 0x5d7   : > { %v1817_v6 = vadd.f32 %v1816_v20, %v3505_v56  ;;  %v1818_v7 = vpop.f32.mrb[61].mxu1 }
 0x5d8   : > { %v1819_v10 = vadd.f32 %v1818_v7, %v3507_v9  ;;  %v1820_v11 = vpop.f32.mrb[62].mxu1 }
 0x5d9   : > { %v2364_v12 = vmul.f32 -1.442695, %v1817_v6  ;;  %v1821_v14 = vadd.f32 %v1820_v11, %v3505_v56  ;;  %v1822_v36 = vpop.f32.mrb[63].mxu1 }
 0x5da   : > { %v2365_v16 = vmul.f32 -1.442695, %v1819_v10  ;;  %v1823_v32 = vadd.f32 %v1822_v36, %v3507_v9 }
 0x5db   : > { %2795 = vpow2.f32 %v2364_v12  ;;  %v2366_v17 = vmul.f32 -1.442695, %v1821_v14 }
 0x5dc   : > { %2797 = vpow2.f32 %v2365_v16  ;;  %v2367_v18 = vmul.f32 -1.442695, %v1823_v32 }
 0x5dd   : > { %v2788_v19 = vpop.eup %2787  ;;  %2799 = vpow2.f32 %v2366_v17 }
 0x5de   : > { %v2790_v21 = vpop.eup %2789  ;;  %v1959_v22 = vadd.f32 1.0, %v2788_v19  ;;  %2801 = vpow2.f32 %v2367_v18  ;;  %v1826_v62 = vpop.f32.mrb[64].mxu1 }
 0x5df   : > { %v2792_v23 = vpop.eup %2791  ;;  %v1960_v25 = vadd.f32 1.0, %v2790_v21  ;;  %v1827_v50 = vadd.f32 %v1826_v62, %v3505_v56  ;;  %v1828_v26 = vpop.f32.mrb[65].mxu1 }
 0x5e0   : > { %v2794_v45 = vpop.eup %2793  ;;  %2803 = vrcp.f32 %v1959_v22  ;;  %v1961_v27 = vadd.f32 1.0, %v2792_v23  ;;  %v1829_v28 = vadd.f32 %v1828_v26, %v3507_v9  ;;  %v1830_v29 = vpop.f32.mrb[66].mxu1 }
 0x5e1   : > { %2805 = vrcp.f32 %v1960_v25  ;;  %v1962_v30 = vadd.f32 1.0, %v2794_v45  ;;  %v2368_v31 = vmul.f32 -1.442695, %v1827_v50  ;;  %v1831_v33 = vadd.f32 %v1830_v29, %v3505_v56  ;;  %v1832_v57 = vpop.f32.mrb[67].mxu1 }
 0x5e2   : > { %2807 = vrcp.f32 %v1961_v27  ;;  %v2369_v0 = vmul.f32 -1.442695, %v1829_v28  ;;  %v1833_v34 = vadd.f32 %v1832_v57, %v3507_v9 }
 0x5e3   : > { %2809 = vrcp.f32 %v1962_v30  ;;  %v2370_v8 = vmul.f32 -1.442695, %v1831_v33 }
 0x5e4   : > { %2811 = vpow2.f32 %v2368_v31  ;;  %v2371_v15 = vmul.f32 -1.442695, %v1833_v34 }
 0x5e5   : > { %v2796_v35 = vpop.eup %2795  ;;  %2813 = vpow2.f32 %v2369_v0 }
 0x5e6   : > { %v2798_v37 = vpop.eup %2797  ;;  %v1963_v38 = vadd.f32 1.0, %v2796_v35  ;;  %2815 = vpow2.f32 %v2370_v8  ;;  %v1836_v39 = vpop.f32.mrb[68].mxu1 }
 0x5e7   : > { %v2800_v40 = vpop.eup %2799  ;;  %v1964_v41 = vadd.f32 1.0, %v2798_v37  ;;  %2817 = vpow2.f32 %v2371_v15  ;;  %v1837_v42 = vadd.f32 %v1836_v39, %v3505_v56  ;;  %v1838_v43 = vpop.f32.mrb[69].mxu1 }
 0x5e8   : > { %v2802_v46 = vpop.eup %2801  ;;  %2819 = vrcp.f32 %v1963_v38  ;;  %v1965_v63 = vadd.f32 1.0, %v2800_v40  ;;  %v1839_v48 = vadd.f32 %v1838_v43, %v3507_v9  ;;  %v1840_v2 = vpop.f32.mrb[70].mxu1 }
 0x5e9   : > { %2821 = vrcp.f32 %v1964_v41  ;;  %v1966_v47 = vadd.f32 1.0, %v2802_v46  ;;  %v2372_v51 = vmul.f32 -1.442695, %v1837_v42  ;;  %v1841_v52 = vadd.f32 %v1840_v2, %v3505_v56  ;;  %v1842_v53 = vpop.f32.mrb[71].mxu1 }
 0x5ea   : > { %v2804_v54 = vpop.eup %2803  ;;  %2823 = vrcp.f32 %v1965_v63  ;;  %v2373_v55 = vmul.f32 -1.442695, %v1839_v48  ;;  %v1843_v49 = vadd.f32 %v1842_v53, %v3507_v9 }
 0x5eb   : > { %v2806_v3 = vpop.eup %2805  ;;  %2825 = vrcp.f32 %v1966_v47  ;;  %v2374_v58 = vmul.f32 -1.442695, %v1841_v52 }
 0x5ec   : > { %v2808_v13 = vpop.eup %2807  ;;  %v2406_v60 = vpack.c.bf16 %v2806_v3, %v2804_v54  ;;  %2827 = vpow2.f32 %v2372_v51  ;;  %v2375_v61 = vmul.f32 -1.442695, %v1843_v49 }
 0x5ed   : > { %v2810_v59 = vpop.eup %2809  ;;  %2829 = vpow2.f32 %v2373_v55 }
 0x5ee   : > { %v2812_v1 = vpop.eup %2811  ;;  %2127 = vst [vmem:[%s3529_s28] sm:$0xff] %v2406_v60  ;;  %v2407_v44 = vpack.c.bf16 %v2810_v59, %v2808_v13  ;;  %2831 = vpow2.f32 %v2374_v58  ;;  %v1846_v4 = vpop.f32.mrb[72].mxu1 }
 0x5ef   : > { %v2814_v24 = vpop.eup %2813  ;;  %v1967_v5 = vadd.f32 1.0, %v2812_v1  ;;  %2833 = vpow2.f32 %v2375_v61  ;;  %v1847_v20 = vadd.f32 %v1846_v4, %v3505_v56  ;;  %v1848_v6 = vpop.f32.mrb[73].mxu1 }
 0x5f0   : > { %v2816_v7 = vpop.eup %2815  ;;  %2128 = vst [vmem:[%s3529_s28 + $0x8] sm:$0xff] %v2407_v44  ;;  %v1968_v10 = vadd.f32 1.0, %v2814_v24  ;;  %v1849_v11 = vadd.f32 %v1848_v6, %v3507_v9  ;;  %v1850_v12 = vpop.f32.mrb[74].mxu1 }
 0x5f1   : > { %v2818_v14 = vpop.eup %2817  ;;  %2835 = vrcp.f32 %v1967_v5  ;;  %v1969_v36 = vadd.f32 1.0, %v2816_v7  ;;  %v2376_v16 = vmul.f32 -1.442695, %v1847_v20  ;;  %v1851_v32 = vadd.f32 %v1850_v12, %v3505_v56  ;;  %v1852_v17 = vpop.f32.mrb[75].mxu1 }
 0x5f2   : > { %v2820_v18 = vpop.eup %2819  ;;  %2837 = vrcp.f32 %v1968_v10  ;;  %v1970_v19 = vadd.f32 1.0, %v2818_v14  ;;  %v2377_v21 = vmul.f32 -1.442695, %v1849_v11  ;;  %v1853_v22 = vadd.f32 %v1852_v17, %v3507_v9 }
 0x5f3   : > { %v2822_v62 = vpop.eup %2821  ;;  %2839 = vrcp.f32 %v1969_v36  ;;  %v2378_v23 = vmul.f32 -1.442695, %v1851_v32 }
 0x5f4   : > { %v2824_v25 = vpop.eup %2823  ;;  %v2408_v50 = vpack.c.bf16 %v2822_v62, %v2820_v18  ;;  %2841 = vrcp.f32 %v1970_v19  ;;  %v2379_v26 = vmul.f32 -1.442695, %v1853_v22 }
 0x5f5   : > { %v2826_v45 = vpop.eup %2825  ;;  %2843 = vpow2.f32 %v2376_v16 }
 0x5f6   : > { %v2828_v27 = vpop.eup %2827  ;;  %2129 = vst [vmem:[%s3529_s28 + $0x10] sm:$0xff] %v2408_v50  ;;  %v2409_v28 = vpack.c.bf16 %v2826_v45, %v2824_v25  ;;  %2845 = vpow2.f32 %v2377_v21  ;;  %v1856_v29 = vpop.f32.mrb[76].mxu1 }
 0x5f7   : > { %v2830_v30 = vpop.eup %2829  ;;  %v1971_v31 = vadd.f32 1.0, %v2828_v27  ;;  %2847 = vpow2.f32 %v2378_v23  ;;  %v1857_v33 = vadd.f32 %v1856_v29, %v3505_v56  ;;  %v1858_v57 = vpop.f32.mrb[77].mxu1 }
 0x5f8   : > { %v2832_v0 = vpop.eup %2831  ;;  %2130 = vst [vmem:[%s3529_s28 + $0x18] sm:$0xff] %v2409_v28  ;;  %v1972_v34 = vadd.f32 1.0, %v2830_v30  ;;  %2849 = vpow2.f32 %v2379_v26  ;;  %v1859_v8 = vadd.f32 %v1858_v57, %v3507_v9  ;;  %v1860_v15 = vpop.f32.mrb[78].mxu1 }
 0x5f9   : > { %v2834_v35 = vpop.eup %2833  ;;  %2851 = vrcp.f32 %v1971_v31  ;;  %v1973_v37 = vadd.f32 1.0, %v2832_v0  ;;  %v2380_v38 = vmul.f32 -1.442695, %v1857_v33  ;;  %v1861_v39 = vadd.f32 %v1860_v15, %v3505_v56  ;;  %v1862_v40 = vpop.f32.mrb[79].mxu1 }
 0x5fa   : > { %2853 = vrcp.f32 %v1972_v34  ;;  %v1974_v41 = vadd.f32 1.0, %v2834_v35  ;;  %v2381_v42 = vmul.f32 -1.442695, %v1859_v8  ;;  %v1863_v43 = vadd.f32 %v1862_v40, %v3507_v9 }
 0x5fb   : > { %v2836_v46 = vpop.eup %2835  ;;  %2855 = vrcp.f32 %v1973_v37  ;;  %v2382_v63 = vmul.f32 -1.442695, %v1861_v39 }
 0x5fc   : > { %v2838_v48 = vpop.eup %2837  ;;  %2857 = vrcp.f32 %v1974_v41  ;;  %v2383_v2 = vmul.f32 -1.442695, %v1863_v43 }
 0x5fd   : > { %v2840_v47 = vpop.eup %2839  ;;  %v2410_v51 = vpack.c.bf16 %v2838_v48, %v2836_v46  ;;  %2859 = vpow2.f32 %v2380_v38 }
 0x5fe   : > { %v2842_v52 = vpop.eup %2841  ;;  %2861 = vpow2.f32 %v2381_v42  ;;  %v1866_v53 = vpop.f32.mrb[80].mxu1 }
 0x5ff   : > { %v2844_v54 = vpop.eup %2843  ;;  %2131 = vst [vmem:[%s3529_s28 + $0x20] sm:$0xff] %v2410_v51  ;;  %v2411_v55 = vpack.c.bf16 %v2842_v52, %v2840_v47  ;;  %2863 = vpow2.f32 %v2382_v63  ;;  %v1867_v49 = vadd.f32 %v1866_v53, %v3505_v56  ;;  %v1868_v3 = vpop.f32.mrb[81].mxu1 }
 0x600   : > { %v2846_v58 = vpop.eup %2845  ;;  %v1975_v13 = vadd.f32 1.0, %v2844_v54  ;;  %2865 = vpow2.f32 %v2383_v2  ;;  %v1869_v60 = vadd.f32 %v1868_v3, %v3507_v9  ;;  %v1870_v61 = vpop.f32.mrb[82].mxu1 }
 0x601   : > { %v2848_v59 = vpop.eup %2847  ;;  %2132 = vst [vmem:[%s3529_s28 + $0x28] sm:$0xff] %v2411_v55  ;;  %v1976_v1 = vadd.f32 1.0, %v2846_v58  ;;  %v1871_v44 = vadd.f32 %v1870_v61, %v3505_v56  ;;  %v1872_v4 = vpop.f32.mrb[83].mxu1  ;;  %v2384_v20 = vmul.f32 -1.442695, %v1867_v49 }
 0x602   : > { %v2850_v24 = vpop.eup %2849  ;;  %2867 = vrcp.f32 %v1975_v13  ;;  %v1977_v5 = vadd.f32 1.0, %v2848_v59  ;;  %v1873_v6 = vadd.f32 %v1872_v4, %v3507_v9  ;;  %v2385_v11 = vmul.f32 -1.442695, %v1869_v60 }
 0x603   : > { %v2852_v7 = vpop.eup %2851  ;;  %2869 = vrcp.f32 %v1976_v1  ;;  %v1978_v10 = vadd.f32 1.0, %v2850_v24  ;;  %v2386_v14 = vmul.f32 -1.442695, %v1871_v44 }
 0x604   : > { %v2854_v12 = vpop.eup %2853  ;;  %2871 = vrcp.f32 %v1977_v5  ;;  %v2387_v56 = vmul.f32 -1.442695, %v1873_v6 }
 0x605   : > { %v2856_v36 = vpop.eup %2855  ;;  %v2412_v16 = vpack.c.bf16 %v2854_v12, %v2852_v7  ;;  %2873 = vrcp.f32 %v1978_v10 }
 0x606   : > { %v2858_v32 = vpop.eup %2857  ;;  %2875 = vpow2.f32 %v2384_v20 }
 0x607   : > { %v2860_v17 = vpop.eup %2859  ;;  %2133 = vst [vmem:[%s3529_s28 + $0x30] sm:$0xff] %v2412_v16  ;;  %v2413_v18 = vpack.c.bf16 %v2858_v32, %v2856_v36  ;;  %2877 = vpow2.f32 %v2385_v11 }
 0x608   : > { %v2862_v19 = vpop.eup %2861  ;;  %v1979_v9 = vadd.f32 1.0, %v2860_v17  ;;  %2879 = vpow2.f32 %v2386_v14 }
 0x609   : > { %v2864_v21 = vpop.eup %2863  ;;  %2134 = vst [vmem:[%s3529_s28 + $0x38] sm:$0xff] %v2413_v18  ;;  %v1980_v22 = vadd.f32 1.0, %v2862_v19  ;;  %2881 = vpow2.f32 %v2387_v56 }
 0x60a   : > { %v2866_v62 = vpop.eup %2865  ;;  %2883 = vrcp.f32 %v1979_v9  ;;  %v1981_v23 = vadd.f32 1.0, %v2864_v21 }
 0x60b   : > { %2885 = vrcp.f32 %v1980_v22  ;;  %v1982_v25 = vadd.f32 1.0, %v2866_v62 }
 0x60c   : > { %v2868_v50 = vpop.eup %2867  ;;  %2887 = vrcp.f32 %v1981_v23 }
 0x60d   : > { %v2870_v26 = vpop.eup %2869  ;;  %2889 = vrcp.f32 %v1982_v25 }
 0x60e   : > { %v2872_v45 = vpop.eup %2871  ;;  %v2414_v27 = vpack.c.bf16 %v2870_v26, %v2868_v50 }
 0x60f   : > { %v2874_v28 = vpop.eup %2873 }
 0x610   : > { %v2876_v29 = vpop.eup %2875  ;;  %2135 = vst [vmem:[%s3529_s28 + $0x40] sm:$0xff] %v2414_v27  ;;  %v2415_v30 = vpack.c.bf16 %v2874_v28, %v2872_v45 }
 0x611   : > { %v2878_v31 = vpop.eup %2877  ;;  %v1983_v33 = vadd.f32 1.0, %v2876_v29 }
 0x612   : > { %v2880_v57 = vpop.eup %2879  ;;  %2136 = vst [vmem:[%s3529_s28 + $0x48] sm:$0xff] %v2415_v30  ;;  %v1984_v0 = vadd.f32 1.0, %v2878_v31 }
 0x613   : > { %v2882_v34 = vpop.eup %2881  ;;  %2891 = vrcp.f32 %v1983_v33  ;;  %v1985_v8 = vadd.f32 1.0, %v2880_v57 }
 0x614   : > { %v2884_v15 = vpop.eup %2883  ;;  %2893 = vrcp.f32 %v1984_v0  ;;  %v1986_v35 = vadd.f32 1.0, %v2882_v34 }
 0x615   : > { %v2886_v37 = vpop.eup %2885  ;;  %2895 = vrcp.f32 %v1985_v8 }
 0x616   : > { %v2888_v38 = vpop.eup %2887  ;;  %v2416_v39 = vpack.c.bf16 %v2886_v37, %v2884_v15  ;;  %2897 = vrcp.f32 %v1986_v35 }
 0x617   : > { %v2890_v40 = vpop.eup %2889 }
 0x618   : > { %2137 = vst [vmem:[%s3529_s28 + $0x50] sm:$0xff] %v2416_v39  ;;  %v2417_v41 = vpack.c.bf16 %v2890_v40, %v2888_v38 }
 0x61a   : > { %2138 = vst [vmem:[%s3529_s28 + $0x58] sm:$0xff] %v2417_v41 }
 0x61d   : > { %v2892_v42 = vpop.eup %2891 }
 0x61e   : > { %v2894_v43 = vpop.eup %2893 }
 0x61f   : > { %v2896_v46 = vpop.eup %2895  ;;  %v2418_v63 = vpack.c.bf16 %v2894_v43, %v2892_v42 }
 0x620   : > { %v2898_v48 = vpop.eup %2897 }
 0x621   : > { %2139 = vst [vmem:[%s3529_s28 + $0x60] sm:$0xff] %v2418_v63  ;;  %v2419_v2 = vpack.c.bf16 %v2898_v48, %v2896_v46 }
 0x623   : > { %2140 = vst [vmem:[%s3529_s28 + $0x68] sm:$0xff] %v2419_v2 }
 0x624 PF: > { %s26_s18 = sadd.s32 1, %s2905_s18  }
 0x625   : > { %p23_p4 = scmp.ge.s32.totalorder %s26_s18, 4  }
 0x627   :  { %25 = sbr.rel (!%p23_p4) target bundleno = 1 (0x1), region = 121 }

</bundles_post_ra>
